<compile_context>
chip_gen: v5e
topology: v5e:2x2
jax: 0.10.0
libtpu: 0.0.40
codegen_flags: <defaults>
</compile_context>

<pallas_src>
import jax
import jax.numpy as jnp
from jax.experimental import pallas as pl
from jax.experimental.pallas import tpu as pltpu

MNIST_IMAGE_SIZE = 28
D_IN = MNIST_IMAGE_SIZE * MNIST_IMAGE_SIZE  # 784
MAXOUT_K = 5
H1 = 256
H2 = 32
TB_MAX = 256  # batch tile rows


def _round_up(n, m):
    return ((n + m - 1) // m) * m


def _discriminator_zero_kernel(x_ref, w1_ref, b1_ref, wm1_ref, bm1_ref,
                               w2_ref, b2_ref, wm2_ref, bm2_ref,
                               w3_ref, b3_ref, o_ref, acc_ref):
    step = pl.program_id(0)

    @pl.when(step == 0)
    def _init():
        # Max accumulator over (branches x batch) must start at -inf, not 0.
        acc_ref[...] = jnp.full((1, MAXOUT_K * H1), -jnp.inf, jnp.float32)

    # --- Linear(784, 256) + LeakyReLU(0.2): bf16 operands, f32 accumulate ---
    h1 = jnp.dot(x_ref[...], w1_ref[...],
                 preferred_element_type=jnp.float32) + b1_ref[...]     # (TB, 256) f32
    h1 = jnp.maximum(h1, 0.2 * h1)

    # --- Maxout(256, 256, k=5): one fused (TB,256)@(256,1280) matmul.
    # Branch biases are constant across the batch, so they are added AFTER the
    # batch-max (in the epilogue); here we only fold this tile into the running max.
    z = jnp.dot(h1.astype(jnp.bfloat16), wm1_ref[...],
                preferred_element_type=jnp.float32)                    # (TB, 1280) f32
    acc_ref[...] = jnp.maximum(acc_ref[...], jnp.max(z, axis=0, keepdims=True))

    # TODO(synk): training-mode nn.Dropout / nn.Dropout1d (random masks) not
    # implemented (inference identity).
    # TODO(synk): v7x dual-TensorCore batch split (parallel axis + partial-max merge)
    # not implemented; single "arbitrary" reduction axis is used on all chips.

    @pl.when(step == pl.num_programs(0) - 1)
    def _epilogue():
        # Finish Maxout-1: add per-branch biases, then max over the 5 branch chunks.
        zb = acc_ref[...] + bm1_ref[...]                               # (1, 1280)
        m1 = zb[:, 0:H1]
        for i in range(1, MAXOUT_K):
            m1 = jnp.maximum(m1, zb[:, i * H1:(i + 1) * H1])           # (1, 256)

        # --- Linear(256, 32) ---
        h2 = jnp.dot(m1, w2_ref[...],
                     preferred_element_type=jnp.float32) + b2_ref[...]  # (1, 32)

        # --- Maxout(32, 32, k=5): single packed (1,32)@(32,160) matmul ---
        z2 = jnp.dot(h2, wm2_ref[...],
                     preferred_element_type=jnp.float32) + bm2_ref[...]  # (1, 160)
        m2 = z2[:, 0:H2]
        for i in range(1, MAXOUT_K):
            m2 = jnp.maximum(m2, z2[:, i * H2:(i + 1) * H2])            # (1, 32)

        # --- LeakyReLU(0.2) ---
        h3 = jnp.maximum(m2, 0.2 * m2)

        # --- Linear(32, 1) + Sigmoid ---
        logit = jnp.dot(h3, w3_ref[...],
                        preferred_element_type=jnp.float32) + b3_ref[...]  # (1, 1)
        o_ref[...] = 1.0 / (1.0 + jnp.exp(-logit))


def discriminator_zero(x, params):
    """x: (B, 1, 28, 28) NCHW.  Returns shape (1,) like the PyTorch module."""
    b = x.shape[0]
    x_flat = x.reshape(b, -1).astype(jnp.float32)                      # nn.Flatten -> (B, 784)

    # Batch tile: multiple of 8 (sublane rule); pad B by duplicating the last row,
    # which leaves the batch-max unchanged.
    tb = min(TB_MAX, _round_up(b, 8))
    b_pad = _round_up(b, tb)
    if b_pad != b:
        pad_rows = jnp.broadcast_to(x_flat[-1:], (b_pad - b, D_IN))
        x_flat = jnp.concatenate([x_flat, pad_rows], axis=0)
    x_bf16 = x_flat.astype(jnp.bfloat16)

    # Pack / cast weights.  Operands of the two big matmuls go bf16.
    w1 = params["w1"].astype(jnp.bfloat16)                             # (784, 256)
    b1 = params["b1"].astype(jnp.float32)                              # (1, 256)
    wm1_packed = jnp.concatenate(
        [params["wm1"][i] for i in range(MAXOUT_K)], axis=1).astype(jnp.bfloat16)  # (256, 1280)
    bm1_packed = jnp.concatenate(
        [params["bm1"][i] for i in range(MAXOUT_K)], axis=1).astype(jnp.float32)   # (1, 1280)
    w2 = params["w2"].astype(jnp.float32)                              # (256, 32)
    b2 = params["b2"].astype(jnp.float32)                              # (1, 32)
    wm2_packed = jnp.concatenate(
        [params["wm2"][i] for i in range(MAXOUT_K)], axis=1).astype(jnp.float32)   # (32, 160)
    bm2_packed = jnp.concatenate(
        [params["bm2"][i] for i in range(MAXOUT_K)], axis=1).astype(jnp.float32)   # (1, 160)
    w3 = params["w3"].astype(jnp.float32)                              # (32, 1)
    b3 = params["b3"].astype(jnp.float32)                              # (1, 1)

    grid = (b_pad // tb,)
    resident = lambda i: (0, 0)   # weights: same block every grid step (VMEM-resident)

    in_specs = [
        pl.BlockSpec((tb, D_IN), lambda i: (i, 0)),                    # x (streamed)
        pl.BlockSpec((D_IN, H1), resident),                            # w1
        pl.BlockSpec((1, H1), resident),                               # b1
        pl.BlockSpec((H1, MAXOUT_K * H1), resident),                   # wm1 packed
        pl.BlockSpec((1, MAXOUT_K * H1), resident),                    # bm1 packed
        pl.BlockSpec((H1, H2), resident),                              # w2
        pl.BlockSpec((1, H2), resident),                               # b2
        pl.BlockSpec((H2, MAXOUT_K * H2), resident),                   # wm2 packed
        pl.BlockSpec((1, MAXOUT_K * H2), resident),                    # bm2 packed
        pl.BlockSpec((H2, 1), resident),                               # w3
        pl.BlockSpec((1, 1), resident),                                # b3
    ]

    out = pl.pallas_call(
        _discriminator_zero_kernel,
        out_shape=jax.ShapeDtypeStruct((1, 1), jnp.float32),
        grid_spec=pltpu.PrefetchScalarGridSpec(
            num_scalar_prefetch=0,
            grid=grid,
            in_specs=in_specs,
            out_specs=pl.BlockSpec((1, 1), resident),
            scratch_shapes=[pltpu.VMEM((1, MAXOUT_K * H1), jnp.float32)],
        ),
        compiler_params=pltpu.CompilerParams(
            dimension_semantics=("arbitrary",),   # batch axis is a max-reduction
        ),
    )(x_bf16, w1, b1, wm1_packed, bm1_packed, w2, b2,
      wm2_packed, bm2_packed, w3, b3)
    return out.reshape(1)


def _init_linear(key, fan_in, fan_out):
    """PyTorch-style uniform(-1/sqrt(fan_in), 1/sqrt(fan_in)); weight stored (in, out)."""
    kw, kb = jax.random.split(key)
    bound = 1.0 / float(fan_in) ** 0.5
    w_t = jax.random.uniform(kw, (fan_in, fan_out), jnp.float32, -bound, bound)
    b = jax.random.uniform(kb, (1, fan_out), jnp.float32, -bound, bound)
    return w_t, b


def make_params(key):
    keys = jax.random.split(key, 3 + 2 * MAXOUT_K)
    w1, b1 = _init_linear(keys[0], D_IN, H1)
    wm1_list, bm1_list = zip(*[_init_linear(keys[1 + i], H1, H1) for i in range(MAXOUT_K)])
    w2, b2 = _init_linear(keys[1 + MAXOUT_K], H1, H2)
    wm2_list, bm2_list = zip(*[_init_linear(keys[2 + MAXOUT_K + i], H2, H2) for i in range(MAXOUT_K)])
    w3, b3 = _init_linear(keys[2 + 2 * MAXOUT_K], H2, 1)
    return {
        "w1": w1, "b1": b1,
        "wm1": jnp.stack(wm1_list), "bm1": jnp.stack(bm1_list),   # (5, 256, 256), (5, 1, 256)
        "w2": w2, "b2": b2,
        "wm2": jnp.stack(wm2_list), "bm2": jnp.stack(bm2_list),   # (5, 32, 32), (5, 1, 32)
        "w3": w3, "b3": b3,
    }


def _reference(x, p):
    """Pure-JAX f32 reference of the exact PyTorch forward semantics."""
    h = x.reshape(x.shape[0], -1).astype(jnp.float32)
    h = h @ p["w1"] + p["b1"]
    h = jnp.where(h > 0, h, 0.2 * h)
    a = jnp.concatenate([h @ p["wm1"][i] + p["bm1"][i] for i in range(MAXOUT_K)], axis=0)
    h = jnp.max(a, axis=0, keepdims=True)          # reduces over branches AND batch
    h = h @ p["w2"] + p["b2"]
    a = jnp.concatenate([h @ p["wm2"][i] + p["bm2"][i] for i in range(MAXOUT_K)], axis=0)
    h = jnp.max(a, axis=0, keepdims=True)
    h = jnp.where(h > 0, h, 0.2 * h)
    logit = h @ p["w3"] + p["b3"]
    return (1.0 / (1.0 + jnp.exp(-logit))).reshape(1)


if __name__ == "__main__":
    key = jax.random.PRNGKey(0)
    kx, kp = jax.random.split(key)
    x = jax.random.uniform(kx, (2, 1, MNIST_IMAGE_SIZE, MNIST_IMAGE_SIZE), jnp.float32)
    params = make_params(kp)

    out = discriminator_zero(x, params)
    out = jax.block_until_ready(out)

    ref = _reference(x, params)
    assert out.shape == (1,), out.shape
    assert bool(jnp.all(jnp.isfinite(out)))
    # bf16 matmul operands (f32 accumulation) -> relaxed tolerance vs f32 reference.
    assert bool(jnp.allclose(out, ref, atol=2e-2, rtol=2e-2)), (out, ref)
    print("KERNEL_OK")
</pallas_src>

<mosaic_0001>
module attributes {stable_mosaic.version = 11 : i64} {
  func.func @_discriminator_zero_kernel(%arg0: i32, %arg1: memref<8x784xbf16, #tpu.memory_space<vmem>>, %arg2: memref<784x256xbf16, #tpu.memory_space<vmem>>, %arg3: memref<1x256xf32, #tpu.memory_space<vmem>>, %arg4: memref<256x1280xbf16, #tpu.memory_space<vmem>>, %arg5: memref<1x1280xf32, #tpu.memory_space<vmem>>, %arg6: memref<256x32xf32, #tpu.memory_space<vmem>>, %arg7: memref<1x32xf32, #tpu.memory_space<vmem>>, %arg8: memref<32x160xf32, #tpu.memory_space<vmem>>, %arg9: memref<1x160xf32, #tpu.memory_space<vmem>>, %arg10: memref<32x1xf32, #tpu.memory_space<vmem>>, %arg11: memref<1x1xf32, #tpu.memory_space<vmem>>, %arg12: memref<1x1xf32, #tpu.memory_space<vmem>>, %arg13: memref<1x1280xf32, #tpu.memory_space<vmem>>) attributes {dimension_semantics = [#tpu.dimension_semantics<arbitrary>], iteration_bounds = array<i64: 1>, scalar_prefetch = 0 : i64, scratch_operands = 1 : i64, tpu.core_type = #tpu.core_type<tc>, window_params = [{transform_indices = @transform_0, window_bounds = array<i64: 8, 784>}, {pipeline_mode = #tpu.pipeline_mode<synchronous>, transform_indices = @transform_1, window_bounds = array<i64: 784, 256>}, {pipeline_mode = #tpu.pipeline_mode<synchronous>, transform_indices = @transform_2, window_bounds = array<i64: 1, 256>}, {pipeline_mode = #tpu.pipeline_mode<synchronous>, transform_indices = @transform_3, window_bounds = array<i64: 256, 1280>}, {pipeline_mode = #tpu.pipeline_mode<synchronous>, transform_indices = @transform_4, window_bounds = array<i64: 1, 1280>}, {pipeline_mode = #tpu.pipeline_mode<synchronous>, transform_indices = @transform_5, window_bounds = array<i64: 256, 32>}, {pipeline_mode = #tpu.pipeline_mode<synchronous>, transform_indices = @transform_6, window_bounds = array<i64: 1, 32>}, {pipeline_mode = #tpu.pipeline_mode<synchronous>, transform_indices = @transform_7, window_bounds = array<i64: 32, 160>}, {pipeline_mode = #tpu.pipeline_mode<synchronous>, transform_indices = @transform_8, window_bounds = array<i64: 1, 160>}, {pipeline_mode = #tpu.pipeline_mode<synchronous>, transform_indices = @transform_9, window_bounds = array<i64: 32, 1>}, {pipeline_mode = #tpu.pipeline_mode<synchronous>, transform_indices = @transform_10, window_bounds = array<i64: 1, 1>}, {pipeline_mode = #tpu.pipeline_mode<synchronous>, transform_indices = @transform_11, window_bounds = array<i64: 1, 1>}]} {
    %c0_i32 = arith.constant 0 : i32
    %0 = arith.cmpi eq, %arg0, %c0_i32 : i32
    %1 = arith.extui %0 : i1 to i32
    %c0_i32_0 = arith.constant 0 : i32
    %2 = arith.cmpi ne, %1, %c0_i32_0 : i32
    scf.if %2 {
      %cst_17 = arith.constant 0xFF800000 : f32
      %23 = vector.broadcast %cst_17 : f32 to vector<1x1280xf32>
      %c0_18 = arith.constant 0 : index
      %c0_19 = arith.constant 0 : index
      %24 = vector.load %arg13[%c0_18, %c0_19] : memref<1x1280xf32, #tpu.memory_space<vmem>>, vector<1x1280xf32>
      tpu.vector_store %arg13[%c0_18, %c0_19], %23 {strides = array<i32>} : memref<1x1280xf32, #tpu.memory_space<vmem>>, vector<1x1280xf32>,
    } else {
    }
    %c0 = arith.constant 0 : index
    %c0_1 = arith.constant 0 : index
    %3 = vector.load %arg1[%c0, %c0_1] : memref<8x784xbf16, #tpu.memory_space<vmem>>, vector<8x784xbf16>
    %c0_2 = arith.constant 0 : index
    %c0_3 = arith.constant 0 : index
    %4 = vector.load %arg2[%c0_2, %c0_3] : memref<784x256xbf16, #tpu.memory_space<vmem>>, vector<784x256xbf16>
    %cst = arith.constant dense<0.000000e+00> : vector<8x256xf32>
    %5 = tpu.matmul %3, %4, %cst {dimension_numbers = #tpu.dot_dimension_numbers<[1], [0], [0], [1], [0, 0, 1, 1], [], []>} : vector<8x784xbf16>, vector<784x256xbf16>, vector<8x256xf32> -> vector<8x256xf32>
    %c0_4 = arith.constant 0 : index
    %c0_5 = arith.constant 0 : index
    %6 = vector.load %arg3[%c0_4, %c0_5] : memref<1x256xf32, #tpu.memory_space<vmem>>, vector<1x256xf32>
    %7 = vector.broadcast %6 : vector<1x256xf32> to vector<8x256xf32>
    %8 = arith.addf %5, %7 : vector<8x256xf32>
    %cst_6 = arith.constant 2.000000e-01 : f32
    %9 = vector.broadcast %cst_6 : f32 to vector<8x256xf32>
    %10 = arith.mulf %9, %8 : vector<8x256xf32>
    %11 = arith.maximumf %8, %10 : vector<8x256xf32>
    %12 = arith.truncf %11 : vector<8x256xf32> to vector<8x256xbf16>
    %c0_7 = arith.constant 0 : index
    %c0_8 = arith.constant 0 : index
    %13 = vector.load %arg4[%c0_7, %c0_8] : memref<256x1280xbf16, #tpu.memory_space<vmem>>, vector<256x1280xbf16>
    %cst_9 = arith.constant dense<0.000000e+00> : vector<8x1280xf32>
    %14 = tpu.matmul %12, %13, %cst_9 {dimension_numbers = #tpu.dot_dimension_numbers<[1], [0], [0], [1], [0, 0, 1, 1], [], []>} : vector<8x256xbf16>, vector<256x1280xbf16>, vector<8x1280xf32> -> vector<8x1280xf32>
    %c0_10 = arith.constant 0 : index
    %c0_11 = arith.constant 0 : index
    %15 = vector.load %arg13[%c0_10, %c0_11] : memref<1x1280xf32, #tpu.memory_space<vmem>>, vector<1x1280xf32>
    %cst_12 = arith.constant dense<0xFF800000> : vector<1280xf32>
    %16 = vector.multi_reduction <maximumf>, %14, %cst_12 [0] : vector<8x1280xf32> to vector<1280xf32>
    %17 = vector.shape_cast %16 : vector<1280xf32> to vector<1x1280xf32>
    %18 = arith.maximumf %15, %17 : vector<1x1280xf32>
    %c0_13 = arith.constant 0 : index
    %c0_14 = arith.constant 0 : index
    %19 = vector.load %arg13[%c0_13, %c0_14] : memref<1x1280xf32, #tpu.memory_space<vmem>>, vector<1x1280xf32>
    tpu.vector_store %arg13[%c0_13, %c0_14], %18 {strides = array<i32>} : memref<1x1280xf32, #tpu.memory_space<vmem>>, vector<1x1280xf32>,
    %c0_i32_15 = arith.constant 0 : i32
    %20 = arith.cmpi eq, %arg0, %c0_i32_15 : i32
    %21 = arith.extui %20 : i1 to i32
    %c0_i32_16 = arith.constant 0 : i32
    %22 = arith.cmpi ne, %21, %c0_i32_16 : i32
    scf.if %22 {
      %c0_17 = arith.constant 0 : index
      %c0_18 = arith.constant 0 : index
      %23 = vector.load %arg13[%c0_17, %c0_18] : memref<1x1280xf32, #tpu.memory_space<vmem>>, vector<1x1280xf32>
      %c0_19 = arith.constant 0 : index
      %c0_20 = arith.constant 0 : index
      %24 = vector.load %arg5[%c0_19, %c0_20] : memref<1x1280xf32, #tpu.memory_space<vmem>>, vector<1x1280xf32>
      %25 = arith.addf %23, %24 : vector<1x1280xf32>
      %26 = vector.extract_strided_slice %25 {offsets = [0, 0], sizes = [1, 256], strides = [1, 1]} : vector<1x1280xf32> to vector<1x256xf32>
      %27 = vector.extract_strided_slice %25 {offsets = [0, 256], sizes = [1, 256], strides = [1, 1]} : vector<1x1280xf32> to vector<1x256xf32>
      %28 = arith.maximumf %26, %27 : vector<1x256xf32>
      %29 = vector.extract_strided_slice %25 {offsets = [0, 512], sizes = [1, 256], strides = [1, 1]} : vector<1x1280xf32> to vector<1x256xf32>
      %30 = arith.maximumf %28, %29 : vector<1x256xf32>
      %31 = vector.extract_strided_slice %25 {offsets = [0, 768], sizes = [1, 256], strides = [1, 1]} : vector<1x1280xf32> to vector<1x256xf32>
      %32 = arith.maximumf %30, %31 : vector<1x256xf32>
      %33 = vector.extract_strided_slice %25 {offsets = [0, 1024], sizes = [1, 256], strides = [1, 1]} : vector<1x1280xf32> to vector<1x256xf32>
      %34 = arith.maximumf %32, %33 : vector<1x256xf32>
      %c0_21 = arith.constant 0 : index
      %c0_22 = arith.constant 0 : index
      %35 = vector.load %arg6[%c0_21, %c0_22] : memref<256x32xf32, #tpu.memory_space<vmem>>, vector<256x32xf32>
      %cst_23 = arith.constant dense<0.000000e+00> : vector<1x32xf32>
      %36 = tpu.matmul %34, %35, %cst_23 {dimension_numbers = #tpu.dot_dimension_numbers<[1], [0], [0], [1], [0, 0, 1, 1], [], []>} : vector<1x256xf32>, vector<256x32xf32>, vector<1x32xf32> -> vector<1x32xf32>
      %c0_24 = arith.constant 0 : index
      %c0_25 = arith.constant 0 : index
      %37 = vector.load %arg7[%c0_24, %c0_25] : memref<1x32xf32, #tpu.memory_space<vmem>>, vector<1x32xf32>
      %38 = arith.addf %36, %37 : vector<1x32xf32>
      %c0_26 = arith.constant 0 : index
      %c0_27 = arith.constant 0 : index
      %39 = vector.load %arg8[%c0_26, %c0_27] : memref<32x160xf32, #tpu.memory_space<vmem>>, vector<32x160xf32>
      %cst_28 = arith.constant dense<0.000000e+00> : vector<1x160xf32>
      %40 = tpu.matmul %38, %39, %cst_28 {dimension_numbers = #tpu.dot_dimension_numbers<[1], [0], [0], [1], [0, 0, 1, 1], [], []>} : vector<1x32xf32>, vector<32x160xf32>, vector<1x160xf32> -> vector<1x160xf32>
      %c0_29 = arith.constant 0 : index
      %c0_30 = arith.constant 0 : index
      %41 = vector.load %arg9[%c0_29, %c0_30] : memref<1x160xf32, #tpu.memory_space<vmem>>, vector<1x160xf32>
      %42 = arith.addf %40, %41 : vector<1x160xf32>
      %43 = vector.extract_strided_slice %42 {offsets = [0, 0], sizes = [1, 32], strides = [1, 1]} : vector<1x160xf32> to vector<1x32xf32>
      %44 = vector.extract_strided_slice %42 {offsets = [0, 32], sizes = [1, 32], strides = [1, 1]} : vector<1x160xf32> to vector<1x32xf32>
      %45 = arith.maximumf %43, %44 : vector<1x32xf32>
      %46 = vector.extract_strided_slice %42 {offsets = [0, 64], sizes = [1, 32], strides = [1, 1]} : vector<1x160xf32> to vector<1x32xf32>
      %47 = arith.maximumf %45, %46 : vector<1x32xf32>
      %48 = vector.extract_strided_slice %42 {offsets = [0, 96], sizes = [1, 32], strides = [1, 1]} : vector<1x160xf32> to vector<1x32xf32>
      %49 = arith.maximumf %47, %48 : vector<1x32xf32>
      %50 = vector.extract_strided_slice %42 {offsets = [0, 128], sizes = [1, 32], strides = [1, 1]} : vector<1x160xf32> to vector<1x32xf32>
      %51 = arith.maximumf %49, %50 : vector<1x32xf32>
      %cst_31 = arith.constant 2.000000e-01 : f32
      %52 = vector.broadcast %cst_31 : f32 to vector<1x32xf32>
      %53 = arith.mulf %52, %51 : vector<1x32xf32>
      %54 = arith.maximumf %51, %53 : vector<1x32xf32>
      %c0_32 = arith.constant 0 : index
      %c0_33 = arith.constant 0 : index
      %55 = vector.load %arg10[%c0_32, %c0_33] : memref<32x1xf32, #tpu.memory_space<vmem>>, vector<32x1xf32>
      %cst_34 = arith.constant dense<0.000000e+00> : vector<1x1xf32>
      %56 = tpu.matmul %54, %55, %cst_34 {dimension_numbers = #tpu.dot_dimension_numbers<[1], [0], [0], [1], [0, 0, 1, 1], [], []>} : vector<1x32xf32>, vector<32x1xf32>, vector<1x1xf32> -> vector<1x1xf32>
      %c0_35 = arith.constant 0 : index
      %c0_36 = arith.constant 0 : index
      %57 = vector.load %arg11[%c0_35, %c0_36] : memref<1x1xf32, #tpu.memory_space<vmem>>, vector<1x1xf32>
      %58 = arith.addf %56, %57 : vector<1x1xf32>
      %cst_37 = arith.constant 0.000000e+00 : f32
      %59 = vector.broadcast %cst_37 : f32 to vector<1x1xf32>
      %60 = arith.subf %59, %58 : vector<1x1xf32>
      %61 = math.exp %60 : vector<1x1xf32>
      %cst_38 = arith.constant 1.000000e+00 : f32
      %62 = vector.broadcast %cst_38 : f32 to vector<1x1xf32>
      %63 = arith.addf %62, %61 : vector<1x1xf32>
      %cst_39 = arith.constant 1.000000e+00 : f32
      %64 = vector.broadcast %cst_39 : f32 to vector<1x1xf32>
      %65 = arith.divf %64, %63 : vector<1x1xf32>
      %c0_40 = arith.constant 0 : index
      %c0_41 = arith.constant 0 : index
      %66 = vector.load %arg12[%c0_40, %c0_41] : memref<1x1xf32, #tpu.memory_space<vmem>>, vector<1x1xf32>
      tpu.vector_store %arg12[%c0_40, %c0_41], %65 {strides = array<i32>} : memref<1x1xf32, #tpu.memory_space<vmem>>, vector<1x1xf32>,
    } else {
    }
    return
  }
  func.func @transform_0(%arg0: i32) -> (i32, i32) {
    %c0_i32 = arith.constant 0 : i32
    %c0_i32_0 = arith.constant 0 : i32
    return %arg0, %c0_i32 : i32, i32
  }
  func.func @transform_1(%arg0: i32) -> (i32, i32) {
    %c0_i32 = arith.constant 0 : i32
    %c0_i32_0 = arith.constant 0 : i32
    %c0_i32_1 = arith.constant 0 : i32
    return %c0_i32, %c0_i32_0 : i32, i32
  }
  func.func @transform_2(%arg0: i32) -> (i32, i32) {
    %c0_i32 = arith.constant 0 : i32
    %c0_i32_0 = arith.constant 0 : i32
    %c0_i32_1 = arith.constant 0 : i32
    return %c0_i32, %c0_i32_0 : i32, i32
  }
  func.func @transform_3(%arg0: i32) -> (i32, i32) {
    %c0_i32 = arith.constant 0 : i32
    %c0_i32_0 = arith.constant 0 : i32
    %c0_i32_1 = arith.constant 0 : i32
    return %c0_i32, %c0_i32_0 : i32, i32
  }
  func.func @transform_4(%arg0: i32) -> (i32, i32) {
    %c0_i32 = arith.constant 0 : i32
    %c0_i32_0 = arith.constant 0 : i32
    %c0_i32_1 = arith.constant 0 : i32
    return %c0_i32, %c0_i32_0 : i32, i32
  }
  func.func @transform_5(%arg0: i32) -> (i32, i32) {
    %c0_i32 = arith.constant 0 : i32
    %c0_i32_0 = arith.constant 0 : i32
    %c0_i32_1 = arith.constant 0 : i32
    return %c0_i32, %c0_i32_0 : i32, i32
  }
  func.func @transform_6(%arg0: i32) -> (i32, i32) {
    %c0_i32 = arith.constant 0 : i32
    %c0_i32_0 = arith.constant 0 : i32
    %c0_i32_1 = arith.constant 0 : i32
    return %c0_i32, %c0_i32_0 : i32, i32
  }
  func.func @transform_7(%arg0: i32) -> (i32, i32) {
    %c0_i32 = arith.constant 0 : i32
    %c0_i32_0 = arith.constant 0 : i32
    %c0_i32_1 = arith.constant 0 : i32
    return %c0_i32, %c0_i32_0 : i32, i32
  }
  func.func @transform_8(%arg0: i32) -> (i32, i32) {
    %c0_i32 = arith.constant 0 : i32
    %c0_i32_0 = arith.constant 0 : i32
    %c0_i32_1 = arith.constant 0 : i32
    return %c0_i32, %c0_i32_0 : i32, i32
  }
  func.func @transform_9(%arg0: i32) -> (i32, i32) {
    %c0_i32 = arith.constant 0 : i32
    %c0_i32_0 = arith.constant 0 : i32
    %c0_i32_1 = arith.constant 0 : i32
    return %c0_i32, %c0_i32_0 : i32, i32
  }
  func.func @transform_10(%arg0: i32) -> (i32, i32) {
    %c0_i32 = arith.constant 0 : i32
    %c0_i32_0 = arith.constant 0 : i32
    %c0_i32_1 = arith.constant 0 : i32
    return %c0_i32, %c0_i32_0 : i32, i32
  }
  func.func @transform_11(%arg0: i32) -> (i32, i32) {
    %c0_i32 = arith.constant 0 : i32
    %c0_i32_0 = arith.constant 0 : i32
    %c0_i32_1 = arith.constant 0 : i32
    return %c0_i32, %c0_i32_0 : i32, i32
  }
}

</mosaic_0001>

<bundles_post_ra>
// kernel: tpu_custom_call.1
= control target key start
LH: loop header
LB: loop body
LE: loop exit
PB: predicated region body
PF: predicated region fallthrough
CT: control target
= control target key end

     0   :  { %s4184_s0 = inlined_call_operand.vmem [shape: bf16[8,784], index: 0, kind: input, shape index: {}]   ;;  %s4185_s1 = inlined_call_operand.hbm [shape: bf16[784,256], index: 1, kind: input, shape index: {}]   ;;  %s4186_s2 = inlined_call_operand.vmem [shape: f32[1,256], index: 2, kind: input, shape index: {}]   ;;  %s4187_s3 = inlined_call_operand.hbm [shape: bf16[256,1280], index: 3, kind: input, shape index: {}]   ;;  %s4188_s4 = inlined_call_operand.vmem [shape: f32[1,1280], index: 4, kind: input, shape index: {}]   ;;  %s4189_s5 = inlined_call_operand.vmem [shape: f32[256,32], index: 5, kind: input, shape index: {}]   ;;  %s4190_s6 = inlined_call_operand.vmem [shape: f32[1,32], index: 6, kind: input, shape index: {}]   ;;  %s4191_s7 = inlined_call_operand.vmem [shape: f32[32,160], index: 7, kind: input, shape index: {}]   ;;  %s4192_s8 = inlined_call_operand.vmem [shape: f32[1,160], index: 8, kind: input, shape index: {}]   ;;  %s4193_s9 = inlined_call_operand.vmem [shape: f32[32,1], index: 9, kind: input, shape index: {}]   ;;  %s4194_s10 = inlined_call_operand.<no memory space> [shape: f32[1,1], index: 10, kind: input, shape index: {}]   ;;  %s4195_s11 = inlined_call_operand.hbm [shape: f32[1,1], index: 11, kind: output, shape index: {}]  }
   0x1   :  { %v16_v0 = vstv %s4194_s10 }
   0x2   :  { %17 = vst [vmem:[#allocation3] sm:$0x1] %v16_v0 }
   0x3   :  { %18 = vsyncpa [#allocation5], 0 }
   0x4   :  { %19 = vsyncpa [#allocation8], 0 }
   0x5   :  { %20 = vsyncpa [#allocation6], 0  ;;  %s27_s21 = sshll.u32 %s4185_s1, 4  ;;  %s3850_s22 = smov [#allocation4]   ;;  %s28_s21 = int_to_ptr.hbm [resolvable:$true] %s27_s21 }
   0x6   :  { %s29_s23 = sshll.u32 %s3850_s22, 4  ;;  %s42_s26 = sshll.u32 %s4187_s3, 4  ;;  %s30_s23 = int_to_ptr.vmem [resolvable:$true] %s29_s23  ;;  %s43_s26 = int_to_ptr.hbm [resolvable:$true] %s42_s26 }
   0x7   :  { %s3851_s27 = smov 128   ;;  %s3852_s28 = smov 8  }
   0x8   :  { %35 = dma.hbm_to_vmem [thread:$0]  %s28_s21, 12544, %s30_s23, [#allocation5], %s3851_s27, %s3851_s27, %s3852_s28  }
   0x9   :  { %s3853_s10 = smov [#allocation7]   ;;  %s3854_s30 = smov 640  }
   0xa   :  { %s44_s29 = sshll.u32 %s3853_s10, 4  ;;  %s3855_s12 = smov 40   ;;  %s45_s29 = int_to_ptr.vmem [resolvable:$true] %s44_s29 }
   0xb   :  { %50 = dma.hbm_to_vmem [thread:$0]  %s43_s26, 20480, %s45_s29, [#allocation8], %s3854_s30, %s3854_s30, %s3855_s12  }
   0xc   :  { %3844 = dma.done.wait [#allocation5], 12544  }
   0xd   :  { %3845 = vsyncadd [#allocation5], 4294954752 }
   0xe   :  { %3846 = dma.done.wait [#allocation8], 20480  }
   0xf   :  { %3847 = vsyncadd [#allocation8], 4294946816  ;;  %v2520_v1 = vld [vmem:[#allocation4 + $0x70] sm:$0xf]  ;;  %v3514_v2 = vld [vmem:[#allocation4 + $0x74] sm:$0xf0] }
  0x10   :  { %v2648_v3 = vld [vmem:[#allocation4 + $0x170] sm:$0xf]  ;;  %v2521_v4 = vor.u32 %v3514_v2, %v2520_v1  ;;  %v3546_v5 = vld [vmem:[#allocation4 + $0x174] sm:$0xf0]  ;;  %v2512_v12 = vld [vmem:[#allocation4 + $0x60] sm:$0xf] }
  0x11   :  { %v2712_v6 = vld [vmem:[#allocation4 + $0x1f0] sm:$0xf]  ;;  %v3562_v7 = vld [vmem:[#allocation4 + $0x1f4] sm:$0xf0]  ;;  %v2649_v8 = vor.u32 %v3546_v5, %v2648_v3  ;;  %v3512_v14 = vld [vmem:[#allocation4 + $0x64] sm:$0xf0] }
  0x12   :  { %v2713_v9 = vor.u32 %v3562_v7, %v2712_v6  ;;  %v2584_v10 = vld [vmem:[#allocation4 + $0xf0] sm:$0xf]  ;;  %v3530_v11 = vld [vmem:[#allocation4 + $0xf4] sm:$0xf0]  ;;  %710 = vmatpush.bf16.msra.mxu0 %v2521_v4  ;;  %v2640_v15 = vld [vmem:[#allocation4 + $0x160] sm:$0xf]  ;;  %v2513_v17 = vor.u32 %v3512_v14, %v2512_v12 }
  0x13   :  { %v2585_v13 = vor.u32 %v3530_v11, %v2584_v10  ;;  %v3544_v16 = vld [vmem:[#allocation4 + $0x164] sm:$0xf0]  ;;  %736 = vmatpush.bf16.msra.mxu2 %v2649_v8  ;;  %v2704_v19 = vld [vmem:[#allocation4 + $0x1e0] sm:$0xf]  ;;  %v2504_v24 = vld [vmem:[#allocation4 + $0x50] sm:$0xf] }
  0x14   :  { %749 = vmatpush.bf16.msra.mxu3 %v2713_v9  ;;  %v2641_v18 = vor.u32 %v3544_v16, %v2640_v15  ;;  %v3560_v20 = vld [vmem:[#allocation4 + $0x1e4] sm:$0xf0]  ;;  %v2576_v21 = vld [vmem:[#allocation4 + $0xe0] sm:$0xf]  ;;  %v3510_v25 = vld [vmem:[#allocation4 + $0x54] sm:$0xf0] }
  0x15   :  { %723 = vmatpush.bf16.msra.mxu1 %v2585_v13  ;;  %v2705_v22 = vor.u32 %v3560_v20, %v2704_v19  ;;  %v3528_v23 = vld [vmem:[#allocation4 + $0xe4] sm:$0xf0]  ;;  %v2632_v27 = vld [vmem:[#allocation4 + $0x150] sm:$0xf]  ;;  %v3542_v28 = vld [vmem:[#allocation4 + $0x154] sm:$0xf0]  ;;  %v2505_v30 = vor.u32 %v3510_v25, %v2504_v24 }
  0x16   :  { %v2577_v26 = vor.u32 %v3528_v23, %v2576_v21  ;;  %v2696_v29 = vld [vmem:[#allocation4 + $0x1d0] sm:$0xf]  ;;  %711 = vmatpush.bf16.msra.mxu0 %v2513_v17  ;;  %v3558_v31 = vld [vmem:[#allocation4 + $0x1d4] sm:$0xf0]  ;;  %v2633_v34 = vor.u32 %v3542_v28, %v2632_v27  ;;  %v2496_v36 = vld [vmem:[#allocation4 + $0x40] sm:$0xf] }
  0x17   :  { %v2568_v32 = vld [vmem:[#allocation4 + $0xd0] sm:$0xf]  ;;  %v3526_v33 = vld [vmem:[#allocation4 + $0xd4] sm:$0xf0]  ;;  %737 = vmatpush.bf16.msra.mxu2 %v2641_v18  ;;  %v2697_v35 = vor.u32 %v3558_v31, %v2696_v29  ;;  %v3508_v37 = vld [vmem:[#allocation4 + $0x44] sm:$0xf0] }
  0x18   :  { %750 = vmatpush.bf16.msra.mxu3 %v2705_v22  ;;  %v2624_v38 = vld [vmem:[#allocation4 + $0x140] sm:$0xf]  ;;  %v2569_v39 = vor.u32 %v3526_v33, %v2568_v32  ;;  %v3540_v40 = vld [vmem:[#allocation4 + $0x144] sm:$0xf0]  ;;  %v2497_v45 = vor.u32 %v3508_v37, %v2496_v36  ;;  %v2488_v48 = vld [vmem:[#allocation4 + $0x30] sm:$0xf] }
  0x19   :  { %724 = vmatpush.bf16.msra.mxu1 %v2577_v26  ;;  %v2688_v41 = vld [vmem:[#allocation4 + $0x1c0] sm:$0xf]  ;;  %v3556_v42 = vld [vmem:[#allocation4 + $0x1c4] sm:$0xf0]  ;;  %v2625_v46 = vor.u32 %v3540_v40, %v2624_v38  ;;  %v3506_v49 = vld [vmem:[#allocation4 + $0x34] sm:$0xf0] }
  0x1a   :  { %v2560_v43 = vld [vmem:[#allocation4 + $0xc0] sm:$0xf]  ;;  %v3524_v44 = vld [vmem:[#allocation4 + $0xc4] sm:$0xf0]  ;;  %712 = vmatpush.bf16.msra.mxu0 %v2505_v30  ;;  %v2689_v47 = vor.u32 %v3556_v42, %v2688_v41  ;;  %v2616_v50 = vld [vmem:[#allocation4 + $0x130] sm:$0xf]  ;;  %v2489_v57 = vor.u32 %v3506_v49, %v2488_v48 }
  0x1b   :  { %738 = vmatpush.bf16.msra.mxu2 %v2633_v34  ;;  %v2561_v51 = vor.u32 %v3524_v44, %v2560_v43  ;;  %v3538_v52 = vld [vmem:[#allocation4 + $0x134] sm:$0xf0]  ;;  %v2680_v53 = vld [vmem:[#allocation4 + $0x1b0] sm:$0xf]  ;;  %v2480_v60 = vld [vmem:[#allocation4 + $0x20] sm:$0xf] }
  0x1c   :  { %751 = vmatpush.bf16.msra.mxu3 %v2697_v35  ;;  %v3554_v54 = vld [vmem:[#allocation4 + $0x1b4] sm:$0xf0]  ;;  %v2552_v55 = vld [vmem:[#allocation4 + $0xb0] sm:$0xf]  ;;  %v2617_v58 = vor.u32 %v3538_v52, %v2616_v50  ;;  %v3504_v61 = vld [vmem:[#allocation4 + $0x24] sm:$0xf0] }
  0x1d   :  { %725 = vmatpush.bf16.msra.mxu1 %v2569_v39  ;;  %v3522_v56 = vld [vmem:[#allocation4 + $0xb4] sm:$0xf0]  ;;  %v2681_v59 = vor.u32 %v3554_v54, %v2680_v53  ;;  %v2608_v62 = vld [vmem:[#allocation4 + $0x120] sm:$0xf]  ;;  %v3536_v0 = vld [vmem:[#allocation4 + $0x124] sm:$0xf0]  ;;  %v2481_v5 = vor.u32 %v3504_v61, %v2480_v60 }
  0x1e   :  { %713 = vmatpush.bf16.msra.mxu0 %v2497_v45  ;;  %v2553_v63 = vor.u32 %v3522_v56, %v2552_v55  ;;  %v2672_v1 = vld [vmem:[#allocation4 + $0x1a0] sm:$0xf]  ;;  %v3552_v2 = vld [vmem:[#allocation4 + $0x1a4] sm:$0xf0]  ;;  %v2609_v6 = vor.u32 %v3536_v0, %v2608_v62  ;;  %v2472_v8 = vld [vmem:[#allocation4 + $0x10] sm:$0xf] }
  0x1f   :  { %739 = vmatpush.bf16.msra.mxu2 %v2625_v46  ;;  %v2544_v3 = vld [vmem:[#allocation4 + $0xa0] sm:$0xf]  ;;  %v3520_v4 = vld [vmem:[#allocation4 + $0xa4] sm:$0xf0]  ;;  %v2673_v7 = vor.u32 %v3552_v2, %v2672_v1  ;;  %v3502_v9 = vld [vmem:[#allocation4 + $0x14] sm:$0xf0] }
  0x20   :  { %752 = vmatpush.bf16.msra.mxu3 %v2689_v47  ;;  %v2600_v10 = vld [vmem:[#allocation4 + $0x110] sm:$0xf]  ;;  %v2545_v11 = vor.u32 %v3520_v4, %v2544_v3  ;;  %v3534_v12 = vld [vmem:[#allocation4 + $0x114] sm:$0xf0]  ;;  %v2464_v17 = vld [vmem:[#allocation4] sm:$0xf]  ;;  %v2473_v18 = vor.u32 %v3502_v9, %v2472_v8 }
  0x21   :  { %726 = vmatpush.bf16.msra.mxu1 %v2561_v51  ;;  %v2664_v13 = vld [vmem:[#allocation4 + $0x190] sm:$0xf]  ;;  %v3550_v14 = vld [vmem:[#allocation4 + $0x194] sm:$0xf0]  ;;  %v3500_v19 = vld [vmem:[#allocation4 + $0x4] sm:$0xf0]  ;;  %v2601_v22 = vor.u32 %v3534_v12, %v2600_v10 }
  0x22   :  { %714 = vmatpush.bf16.msra.mxu0 %v2489_v57  ;;  %v2536_v15 = vld [vmem:[#allocation4 + $0x90] sm:$0xf]  ;;  %v3518_v16 = vld [vmem:[#allocation4 + $0x94] sm:$0xf0]  ;;  %v2592_v20 = vld [vmem:[#allocation4 + $0x100] sm:$0xf]  ;;  %v2665_v23 = vor.u32 %v3550_v14, %v2664_v13  ;;  %v2465_v34 = vor.u32 %v3500_v19, %v2464_v17 }
  0x23   :  { %740 = vmatpush.bf16.msra.mxu2 %v2617_v58  ;;  %v3532_v21 = vld [vmem:[#allocation4 + $0x104] sm:$0xf0]  ;;  %v2656_v24 = vld [vmem:[#allocation4 + $0x180] sm:$0xf]  ;;  %v2537_v27 = vor.u32 %v3518_v16, %v2536_v15  ;;  %v2776_v28 = vld [vmem:[#allocation4 + $0x270] sm:$0xf] }
  0x24   :  { %753 = vmatpush.bf16.msra.mxu3 %v2681_v59  ;;  %v3548_v25 = vld [vmem:[#allocation4 + $0x184] sm:$0xf0]  ;;  %v85_v26 = vld [vmem:[%s4184_s0 + $0x8] sm:$0xff]  ;;  %v3578_v29 = vld [vmem:[#allocation4 + $0x274] sm:$0xf0]  ;;  %v2593_v38 = vor.u32 %v3532_v21, %v2592_v20  ;;  %vm706_vm0 = vcmask 130048  }
  0x25   :  { %727 = vmatpush.bf16.msra.mxu1 %v2553_v63  ;;  %v3513_v30 = vld [vmem:[#allocation4 + $0x74] sm:$0xf]  ;;  %v2522_v31 = vld [vmem:[#allocation4 + $0x78] sm:$0xf0]  ;;  %v2528_v32 = vld [vmem:[#allocation4 + $0x80] sm:$0xf]  ;;  %v198_v35 = vunpack.c.l.b16 %v85_v26  ;;  %v2657_v39 = vor.u32 %v3548_v25, %v2656_v24  ;;  %v2777_v43 = vor.u32 %v3578_v29, %v2776_v28  ;;  %v199_v54 = vunpack.c.h.b16 %v85_v26 }
  0x26   :  { %715 = vmatpush.bf16.msra.mxu0 %v2481_v5  ;;  %v3516_v33 = vld [vmem:[#allocation4 + $0x84] sm:$0xf0]  ;;  %v2848_v36 = vld [vmem:[#allocation4 + $0x300] sm:$0xf]  ;;  %v2840_v40 = vld [vmem:[#allocation4 + $0x2f0] sm:$0xf]  ;;  %v2525_v44 = vor.u32 %v3513_v30, %v2522_v31 }
  0x27   :  { %741 = vmatpush.bf16.msra.mxu2 %v2609_v6  ;;  %v3596_v37 = vld [vmem:[#allocation4 + $0x304] sm:$0xf0]  ;;  %v3594_v41 = vld [vmem:[#allocation4 + $0x2f4] sm:$0xf0]  ;;  %v3529_v42 = vld [vmem:[#allocation4 + $0xf4] sm:$0xf]  ;;  %v2529_v45 = vor.u32 %v3516_v33, %v2528_v32  ;;  %v3936_v56 = vpack.c.b16 %v198_v35, %v198_v35  ;;  %v3940_v6 = vpack.c.b16 %v199_v54, %v199_v54 }
  0x28   :  { %754 = vmatpush.bf16.msra.mxu3 %v2673_v7  ;;  %v2586_v46 = vld [vmem:[#allocation4 + $0xf8] sm:$0xf0]  ;;  %v2768_v47 = vld [vmem:[#allocation4 + $0x260] sm:$0xf]  ;;  %v2849_v49 = vor.u32 %v3596_v37, %v2848_v36  ;;  %v3576_v50 = vld [vmem:[#allocation4 + $0x264] sm:$0xf0]  ;;  %v2841_v57 = vor.u32 %v3594_v41, %v2840_v40 }
  0x29   :  { %728 = vmatpush.bf16.msra.mxu1 %v2545_v11  ;;  %v84_v48 = vld [vmem:[%s4184_s0] sm:$0xff]  ;;  %v3511_v51 = vld [vmem:[#allocation4 + $0x64] sm:$0xf]  ;;  %v2514_v52 = vld [vmem:[#allocation4 + $0x68] sm:$0xf0]  ;;  %v2589_v58 = vor.u32 %v3529_v42, %v2586_v46  ;;  %v2769_v62 = vor.u32 %v3576_v50, %v2768_v47  ;;  %vm2198_vm1 = vcmask 1040384  }
  0x2a   :  { %716 = vmatpush.bf16.msra.mxu0 %v2473_v18  ;;  %v196_v53 = vunpack.c.l.b16 %v84_v48  ;;  %v197_v55 = vunpack.c.h.b16 %v84_v48  ;;  %v2832_v59 = vld [vmem:[#allocation4 + $0x2e0] sm:$0xf]  ;;  %v3592_v60 = vld [vmem:[#allocation4 + $0x2e4] sm:$0xf0]  ;;  %v2517_v63 = vor.u32 %v3511_v51, %v2514_v52  ;;  %v3527_v0 = vld [vmem:[#allocation4 + $0xe4] sm:$0xf] }
  0x2b   :  { %742 = vmatpush.bf16.msra.mxu2 %v2601_v22  ;;  %v2578_v1 = vld [vmem:[#allocation4 + $0xe8] sm:$0xf0]  ;;  %v2760_v2 = vld [vmem:[#allocation4 + $0x250] sm:$0xf]  ;;  %v3574_v3 = vld [vmem:[#allocation4 + $0x254] sm:$0xf0]  ;;  %v2833_v8 = vor.u32 %v3592_v60, %v2832_v59 }
  0x2c   :  { %755 = vmatpush.bf16.msra.mxu3 %v2665_v23  ;;  %v3938_v61 = vpack.c.b16 %v196_v53, %v196_v53  ;;  %v3509_v4 = vld [vmem:[#allocation4 + $0x54] sm:$0xf]  ;;  %v2506_v5 = vld [vmem:[#allocation4 + $0x58] sm:$0xf0]  ;;  %v3942_v7 = vpack.c.b16 %v197_v55, %v197_v55  ;;  %v2581_v9 = vor.u32 %v3527_v0, %v2578_v1  ;;  %v2824_v10 = vld [vmem:[#allocation4 + $0x2d0] sm:$0xf]  ;;  %v2761_v12 = vor.u32 %v3574_v3, %v2760_v2 }
  0x2d   :  { %729 = vmatpush.bf16.msra.mxu1 %v2537_v27  ;;  %v3590_v11 = vld [vmem:[#allocation4 + $0x2d4] sm:$0xf0]  ;;  %v2509_v13 = vor.u32 %v3509_v4, %v2506_v5  ;;  %v3525_v14 = vld [vmem:[#allocation4 + $0xd4] sm:$0xf]  ;;  %v2570_v15 = vld [vmem:[#allocation4 + $0xd8] sm:$0xf0] }
  0x2e   :  { %717 = vmatpush.bf16.msra.mxu0 %v2465_v34  ;;  %v2752_v16 = vld [vmem:[#allocation4 + $0x240] sm:$0xf]  ;;  %v3572_v17 = vld [vmem:[#allocation4 + $0x244] sm:$0xf0]  ;;  %v3507_v18 = vld [vmem:[#allocation4 + $0x44] sm:$0xf]  ;;  %v2825_v20 = vor.u32 %v3590_v11, %v2824_v10  ;;  %v2573_v21 = vor.u32 %v3525_v14, %v2570_v15 }
  0x2f   :  { %743 = vmatpush.bf16.msra.mxu2 %v2593_v38  ;;  %v2498_v19 = vld [vmem:[#allocation4 + $0x48] sm:$0xf0]  ;;  %v2816_v22 = vld [vmem:[#allocation4 + $0x2c0] sm:$0xf]  ;;  %v3588_v23 = vld [vmem:[#allocation4 + $0x2c4] sm:$0xf0]  ;;  %v2753_v25 = vor.u32 %v3572_v17, %v2752_v16 }
  0x30   :  { %756 = vmatpush.bf16.msra.mxu3 %v2657_v39  ;;  %v3523_v24 = vld [vmem:[#allocation4 + $0xc4] sm:$0xf]  ;;  %v2501_v26 = vor.u32 %v3507_v18, %v2498_v19  ;;  %v2562_v27 = vld [vmem:[#allocation4 + $0xc8] sm:$0xf0]  ;;  %v2744_v28 = vld [vmem:[#allocation4 + $0x230] sm:$0xf]  ;;  %v2817_v33 = vor.u32 %v3588_v23, %v2816_v22 }
  0x31   :  { %730 = vmatpush.bf16.msra.mxu1 %v2529_v45  ;;  %718 = vmatmul.bf16.vlgmr.msra.gmra.mxu0 %v3938_v61  ;;  %v3570_v29 = vld [vmem:[#allocation4 + $0x234] sm:$0xf0]  ;;  %v3505_v30 = vld [vmem:[#allocation4 + $0x34] sm:$0xf]  ;;  %v2490_v31 = vld [vmem:[#allocation4 + $0x38] sm:$0xf0]  ;;  %v2565_v35 = vor.u32 %v3523_v24, %v2562_v27 }
  0x32   :  { %762 = vmatpush.bf16.msrb.mxu0 %v2777_v43  ;;  %744 = vmatmul.bf16.vlgmr.msra.gmra.mxu2 %v3936_v56  ;;  %v87_v32 = vld [vmem:[%s4184_s0 + $0x18] sm:$0xf]  ;;  %v3586_v37 = vld [vmem:[#allocation4 + $0x2b4] sm:$0xf0]  ;;  %v2745_v38 = vor.u32 %v3570_v29, %v2744_v28  ;;  %v2493_v39 = vor.u32 %v3505_v30, %v2490_v31  ;;  %v3521_v40 = vld [vmem:[#allocation4 + $0xb4] sm:$0xf] }
  0x33   :  { %795 = vmatpush.bf16.msrb.mxu2 %v2849_v49  ;;  %757 = vmatmul.bf16.vlgmr.msra.gmra.mxu3 %v3940_v6  ;;  %v202_v34 = vunpack.c.l.b16 %v87_v32  ;;  %v2808_v36 = vld [vmem:[#allocation4 + $0x2b0] sm:$0xf]  ;;  %v2554_v41 = vld [vmem:[#allocation4 + $0xb8] sm:$0xf0]  ;;  %v2736_v42 = vld [vmem:[#allocation4 + $0x220] sm:$0xf] }
  0x34   :  { %801 = vmatpush.bf16.msrb.mxu3 %v2525_v44  ;;  %731 = vmatmul.bf16.vlgmr.msra.gmra.mxu1 %v3942_v7  ;;  %v3568_v43 = vld [vmem:[#allocation4 + $0x224] sm:$0xf0]  ;;  %v3503_v44 = vld [vmem:[#allocation4 + $0x24] sm:$0xf]  ;;  %v2482_v45 = vld [vmem:[#allocation4 + $0x28] sm:$0xf0]  ;;  %v2809_v46 = vor.u32 %v3586_v37, %v2808_v36  ;;  %v2557_v48 = vor.u32 %v3521_v40, %v2554_v41 }
  0x35   :  { %775 = vmatpush.bf16.msrb.mxu1 %v2841_v57  ;;  %v3951_v47 = vpack.c.b16 %v202_v34, %v202_v34  ;;  %v2800_v49 = vld [vmem:[#allocation4 + $0x2a0] sm:$0xf]  ;;  %v3584_v50 = vld [vmem:[#allocation4 + $0x2a4] sm:$0xf0]  ;;  %v2737_v51 = vor.u32 %v3568_v43, %v2736_v42  ;;  %v2485_v52 = vor.u32 %v3503_v44, %v2482_v45  ;;  %v3519_v53 = vld [vmem:[#allocation4 + $0xa4] sm:$0xf] }
  0x36   :  { %763 = vmatpush.bf16.msrb.mxu0 %v2769_v62  ;;  %v2546_v54 = vld [vmem:[#allocation4 + $0xa8] sm:$0xf0]  ;;  %v2728_v55 = vld [vmem:[#allocation4 + $0x210] sm:$0xf]  ;;  %v3566_v57 = vld [vmem:[#allocation4 + $0x214] sm:$0xf0]  ;;  %v2801_v60 = vor.u32 %v3584_v50, %v2800_v49 }
  0x37   :  { %814 = vmatpush.bf16.msra.mxu2 %v2589_v58  ;;  %v3501_v58 = vld [vmem:[#allocation4 + $0x14] sm:$0xf]  ;;  %v2474_v59 = vld [vmem:[#allocation4 + $0x18] sm:$0xf0]  ;;  %v2792_v62 = vld [vmem:[#allocation4 + $0x290] sm:$0xf]  ;;  %v2729_v3 = vor.u32 %v3566_v57, %v2728_v55 }
  0x38   :  { %802 = vmatpush.bf16.msrb.mxu3 %v2517_v63  ;;  %v2549_v63 = vor.u32 %v3519_v53, %v2546_v54  ;;  %v3582_v0 = vld [vmem:[#allocation4 + $0x294] sm:$0xf0]  ;;  %v3517_v1 = vld [vmem:[#allocation4 + $0x94] sm:$0xf]  ;;  %v2538_v2 = vld [vmem:[#allocation4 + $0x98] sm:$0xf0]  ;;  %v2477_v4 = vor.u32 %v3501_v58, %v2474_v59 }
  0x39   :  { %776 = vmatpush.bf16.msrb.mxu1 %v2833_v8  ;;  %v2720_v5 = vld [vmem:[#allocation4 + $0x200] sm:$0xf]  ;;  %v3564_v8 = vld [vmem:[#allocation4 + $0x204] sm:$0xf0]  ;;  %v3499_v10 = vld [vmem:[#allocation4 + $0x4] sm:$0xf]  ;;  %v2541_v17 = vor.u32 %v3517_v1, %v2538_v2 }
  0x3a   :  { %764 = vmatpush.bf16.msrb.mxu0 %v2761_v12  ;;  %v2466_v11 = vld [vmem:[#allocation4 + $0x8] sm:$0xf0]  ;;  %v3545_v12 = vld [vmem:[#allocation4 + $0x174] sm:$0xf]  ;;  %v2650_v14 = vld [vmem:[#allocation4 + $0x178] sm:$0xf0] }
  0x3b   :  { %815 = vmatpush.bf16.msra.mxu2 %v2581_v9  ;;  %v86_v9 = vld [vmem:[%s4184_s0 + $0x10] sm:$0xff]  ;;  %v3577_v15 = vld [vmem:[#allocation4 + $0x274] sm:$0xf]  ;;  %v2778_v16 = vld [vmem:[#allocation4 + $0x278] sm:$0xf0]  ;;  %v2469_v22 = vor.u32 %v3499_v10, %v2466_v11  ;;  %vm2200_vm2 = vcmask 1042434  }
  0x3c   :  { %803 = vmatpush.bf16.msrb.mxu3 %v2509_v13  ;;  %v2793_v13 = vor.u32 %v3582_v0, %v2792_v62  ;;  %v2784_v18 = vld [vmem:[#allocation4 + $0x280] sm:$0xf]  ;;  %v3580_v19 = vld [vmem:[#allocation4 + $0x284] sm:$0xf0]  ;;  %v3515_v23 = vld [vmem:[#allocation4 + $0x84] sm:$0xf]  ;;  %v2781_v27 = vor.u32 %v3577_v15, %v2778_v16  ;;  %v201_v31 = vunpack.c.h.b16 %v86_v9 }
  0x3d   :  { %777 = vmatpush.bf16.msrb.mxu1 %v2825_v20  ;;  %v200_v20 = vunpack.c.l.b16 %v86_v9  ;;  %v2530_v24 = vld [vmem:[#allocation4 + $0x88] sm:$0xf0]  ;;  %v2714_v28 = vld [vmem:[#allocation4 + $0x1f8] sm:$0xf0]  ;;  %v3593_v29 = vld [vmem:[#allocation4 + $0x2f4] sm:$0xf]  ;;  %v2785_v32 = vor.u32 %v3580_v19, %v2784_v18 }
  0x3e   :  { %765 = vmatpush.bf16.msrb.mxu0 %v2753_v25  ;;  %v3561_v25 = vld [vmem:[#allocation4 + $0x1f4] sm:$0xf]  ;;  %v2842_v30 = vld [vmem:[#allocation4 + $0x2f8] sm:$0xf0]  ;;  %v2642_v34 = vld [vmem:[#allocation4 + $0x168] sm:$0xf0]  ;;  %v2533_v36 = vor.u32 %v3515_v23, %v2530_v24  ;;  %v3960_v42 = vpack.c.b16 %v201_v31, %v201_v31 }
  0x3f   :  { %816 = vmatpush.bf16.msra.mxu2 %v2573_v21  ;;  %v2721_v21 = vor.u32 %v3564_v8, %v2720_v5  ;;  %v3575_v37 = vld [vmem:[#allocation4 + $0x264] sm:$0xf]  ;;  %v2845_v40 = vor.u32 %v3593_v29, %v2842_v30  ;;  %v2706_v44 = vld [vmem:[#allocation4 + $0x1e8] sm:$0xf0]  ;;  %v3541_v49 = vld [vmem:[#allocation4 + $0x154] sm:$0xf] }
  0x40   :  { %804 = vmatpush.bf16.msrb.mxu3 %v2501_v26  ;;  %v2653_v26 = vor.u32 %v3545_v12, %v2650_v14  ;;  %v3559_v41 = vld [vmem:[#allocation4 + $0x1e4] sm:$0xf]  ;;  %v2634_v50 = vld [vmem:[#allocation4 + $0x158] sm:$0xf0]  ;;  %v3557_v55 = vld [vmem:[#allocation4 + $0x1d4] sm:$0xf] }
  0x41   :  { %778 = vmatpush.bf16.msrb.mxu1 %v2817_v33  ;;  %v3543_v33 = vld [vmem:[#allocation4 + $0x164] sm:$0xf]  ;;  %v2709_v53 = vor.u32 %v3559_v41, %v2706_v44  ;;  %v2637_v57 = vor.u32 %v3541_v49, %v2634_v50  ;;  %v2698_v58 = vld [vmem:[#allocation4 + $0x1d8] sm:$0xf0]  ;;  %v3589_v59 = vld [vmem:[#allocation4 + $0x2d4] sm:$0xf] }
  0x42   :  { %766 = vmatpush.bf16.msrb.mxu0 %v2745_v38  ;;  %2854 = vmatmul.msk.bf16.vlgmr.msrb.gmra.mxu2 %vm706_vm0, %v3951_v47  ;;  %v2770_v38 = vld [vmem:[#allocation4 + $0x268] sm:$0xf0]  ;;  %v2645_v43 = vor.u32 %v3543_v33, %v2642_v34  ;;  %v3591_v45 = vld [vmem:[#allocation4 + $0x2e4] sm:$0xf]  ;;  %v2618_v14 = vld [vmem:[#allocation4 + $0x138] sm:$0xf0] }
  0x43   :  { %817 = vmatpush.bf16.msra.mxu2 %v2565_v35  ;;  %v3958_v35 = vpack.c.b16 %v200_v20, %v200_v20  ;;  %v2626_v0 = vld [vmem:[#allocation4 + $0x148] sm:$0xf0]  ;;  %v3571_v1 = vld [vmem:[#allocation4 + $0x244] sm:$0xf]  ;;  %v3569_v15 = vld [vmem:[#allocation4 + $0x234] sm:$0xf] }
  0x44   :  { %805 = vmatpush.bf16.msrb.mxu3 %v2493_v39  ;;  %v2717_v39 = vor.u32 %v3561_v25, %v2714_v28  ;;  %v2754_v2 = vld [vmem:[#allocation4 + $0x248] sm:$0xf0]  ;;  %v3555_v5 = vld [vmem:[#allocation4 + $0x1c4] sm:$0xf]  ;;  %v2682_v19 = vld [vmem:[#allocation4 + $0x1b8] sm:$0xf0] }
  0x45   :  { %779 = vmatpush.bf16.msrb.mxu1 %v2809_v46  ;;  %v2834_v46 = vld [vmem:[#allocation4 + $0x2e8] sm:$0xf0]  ;;  %v3587_v10 = vld [vmem:[#allocation4 + $0x2c4] sm:$0xf]  ;;  %v2757_v12 = vor.u32 %v3571_v1, %v2754_v2  ;;  %v3585_v20 = vld [vmem:[#allocation4 + $0x2b4] sm:$0xf] }
  0x46   :  { %767 = vmatpush.bf16.msrb.mxu0 %v2737_v51  ;;  %v3573_v51 = vld [vmem:[#allocation4 + $0x254] sm:$0xf]  ;;  %v2837_v54 = vor.u32 %v3591_v45, %v2834_v46  ;;  %v2690_v9 = vld [vmem:[#allocation4 + $0x1c8] sm:$0xf0]  ;;  %v3535_v23 = vld [vmem:[#allocation4 + $0x124] sm:$0xf] }
  0x47   :  { %818 = vmatpush.bf16.msra.mxu2 %v2557_v48  ;;  %v2773_v48 = vor.u32 %v3575_v37, %v2770_v38  ;;  %v2818_v11 = vld [vmem:[#allocation4 + $0x2c8] sm:$0xf0]  ;;  %v2693_v16 = vor.u32 %v3555_v5, %v2690_v9  ;;  %v3567_v25 = vld [vmem:[#allocation4 + $0x224] sm:$0xf]  ;;  %v2602_v37 = vld [vmem:[#allocation4 + $0x118] sm:$0xf0] }
  0x48   :  { %806 = vmatpush.bf16.msrb.mxu3 %v2485_v52  ;;  %v2762_v52 = vld [vmem:[#allocation4 + $0x258] sm:$0xf0]  ;;  %v2610_v24 = vld [vmem:[#allocation4 + $0x128] sm:$0xf0]  ;;  %v3551_v29 = vld [vmem:[#allocation4 + $0x1a4] sm:$0xf] }
  0x49   :  { %780 = vmatpush.bf16.msrb.mxu1 %v2801_v60  ;;  %v2826_v60 = vld [vmem:[#allocation4 + $0x2d8] sm:$0xf0]  ;;  %v2765_v62 = vor.u32 %v3573_v51, %v2762_v52  ;;  %v2613_v30 = vor.u32 %v3535_v23, %v2610_v24  ;;  %v2674_v31 = vld [vmem:[#allocation4 + $0x1a8] sm:$0xf0]  ;;  %v3565_v38 = vld [vmem:[#allocation4 + $0x214] sm:$0xf] }
  0x4a   :  { %768 = vmatpush.bf16.msrb.mxu0 %v2729_v3  ;;  %v2701_v3 = vor.u32 %v3557_v55, %v2698_v58  ;;  %v2802_v33 = vld [vmem:[#allocation4 + $0x2a8] sm:$0xf0]  ;;  %v2666_v45 = vld [vmem:[#allocation4 + $0x198] sm:$0xf0]  ;;  %v3581_v46 = vld [vmem:[#allocation4 + $0x294] sm:$0xf] }
  0x4b   :  { %819 = vmatpush.bf16.msra.mxu2 %v2549_v63  ;;  %v3539_v63 = vld [vmem:[#allocation4 + $0x144] sm:$0xf]  ;;  %v2594_v51 = vld [vmem:[#allocation4 + $0x108] sm:$0xf0]  ;;  %v3642_v23 = vld [vmem:[#allocation7 + $0x164] sm:$0xf0] }
  0x4c   :  { %807 = vmatpush.bf16.msrb.mxu3 %v2477_v4  ;;  %v2829_v4 = vor.u32 %v3589_v59, %v2826_v60  ;;  %v2629_v8 = vor.u32 %v3539_v63, %v2626_v0  ;;  %v3531_v50 = vld [vmem:[#allocation4 + $0x104] sm:$0xf]  ;;  %v2850_v55 = vld [vmem:[#allocation4 + $0x308] sm:$0xf0]  ;;  %v3020_v24 = vld [vmem:[#allocation7 + $0x168] sm:$0xf0] }
  0x4d   :  { %781 = vmatpush.bf16.msrb.mxu1 %v2793_v13  ;;  %v3537_v13 = vld [vmem:[#allocation4 + $0x134] sm:$0xf]  ;;  %v3563_v52 = vld [vmem:[#allocation4 + $0x204] sm:$0xf]  ;;  %v2597_v59 = vor.u32 %v3531_v50, %v2594_v51  ;;  %v2786_v1 = vld [vmem:[#allocation4 + $0x288] sm:$0xf0] }
  0x4e   :  { %769 = vmatpush.bf16.msrb.mxu0 %v2721_v21  ;;  %v2621_v18 = vor.u32 %v3537_v13, %v2618_v14  ;;  %v2810_v21 = vld [vmem:[#allocation4 + $0x2b8] sm:$0xf0]  ;;  %v3547_v60 = vld [vmem:[#allocation4 + $0x184] sm:$0xf]  ;;  %v3098_v13 = vld [vmem:[#allocation7 + $0x1e0] sm:$0xf] }
  0x4f   :  { %820 = vmatpush.bf16.msra.mxu2 %v2541_v17  ;;  %v3553_v17 = vld [vmem:[#allocation4 + $0x1b4] sm:$0xf]  ;;  %v2813_v28 = vor.u32 %v3585_v20, %v2810_v21  ;;  %v3579_v0 = vld [vmem:[#allocation4 + $0x284] sm:$0xf]  ;;  %v3662_v14 = vld [vmem:[#allocation7 + $0x204] sm:$0xf0] }
  0x50   :  { %808 = vmatpush.bf16.msrb.mxu3 %v2469_v22  ;;  %v3667_v5 = vld [vmem:[#allocation7 + $0x234] sm:$0xf]  ;;  %v3060_v20 = vld [vmem:[#allocation7 + $0x1b8] sm:$0xf0]  ;;  %v2860_v50 = vld [vmem:[#allocation7 + $0x28] sm:$0xf0] }
  0x51   :  { %782 = vmatpush.bf16.msrb.mxu1 %v2785_v32  ;;  %770 = vmatmul.bf16.vlgmr.msrb.gmra.mxu0 %v3958_v35  ;;  %v3583_v32 = vld [vmem:[#allocation4 + $0x2a4] sm:$0xf]  ;;  %v3146_v51 = vld [vmem:[#allocation7 + $0x238] sm:$0xf]  ;;  %vm2202_vm3 = vcmask 1041408   ;;  %vm2204_vm4 = vcmask 1044484  }
  0x52   :  { %827 = vmatpush.bf16.msra.mxu0 %v2653_v26  ;;  %v2738_v26 = vld [vmem:[#allocation4 + $0x228] sm:$0xf0]  ;;  %v2805_v41 = vor.u32 %v3583_v32, %v2802_v33  ;;  %v3622_v32 = vld [vmem:[#allocation7 + $0xc4] sm:$0xf0]  ;;  %v3617_v33 = vld [vmem:[#allocation7 + $0xa4] sm:$0xf] }
  0x53   :  { %821 = vmatpush.bf16.msra.mxu2 %v2533_v36  ;;  %809 = vmatmul.bf16.vlgmr.msrb.gmra.mxu3 %v3938_v61  ;;  %v2821_v61 = vor.u32 %v3587_v10, %v2818_v11  ;;  %v2741_v34 = vor.u32 %v3567_v25, %v2738_v26  ;;  %v3533_v36 = vld [vmem:[#allocation4 + $0x114] sm:$0xf]  ;;  %v2789_v10 = vor.u32 %v3579_v0, %v2786_v1  ;;  %v3066_v0 = vld [vmem:[#allocation7 + $0x198] sm:$0xf]  ;;  %v3653_v1 = vld [vmem:[#allocation7 + $0x1bc] sm:$0xf0] }
  0x54   :  { %853 = vmatpush.bf16.msra.mxu3 %v2781_v27  ;;  %783 = vmatmul.bf16.vlgmr.msrb.gmra.mxu1 %v3960_v42  ;;  %v2685_v27 = vor.u32 %v3553_v17, %v2682_v19  ;;  %v2605_v44 = vor.u32 %v3533_v36, %v2602_v37  ;;  %v3058_v17 = vld [vmem:[#allocation7 + $0x190] sm:$0xf]  ;;  %v3647_v19 = vld [vmem:[#allocation7 + $0x194] sm:$0xf]  ;;  %vm2206_vm6 = vcmask 1046534   ;;  %vm2208_vm7 = vcmask 1045508  }
  0x55   :  { %840 = vmatpush.bf16.msra.mxu1 %v2717_v39  ;;  %v2730_v39 = vld [vmem:[#allocation4 + $0x218] sm:$0xf0]  ;;  %vm2210_vm8 = vcmask 1043456   ;;  %vm2335_vm9 = vcmask 261120   ;;  %s3858_s1 = smov 96   ;;  %vm2442_vm13 = vcmask 0  }
  0x56   :  { %828 = vmatpush.bf16.msra.mxu0 %v2645_v43  ;;  %822 = vmatmul.bf16.vlgmr.msra.gmra.mxu2 %v3942_v7  ;;  %v2746_v7 = vld [vmem:[#allocation4 + $0x238] sm:$0xf0]  ;;  %v3549_v43 = vld [vmem:[#allocation4 + $0x194] sm:$0xf]  ;;  %v2733_v49 = vor.u32 %v3565_v38, %v2730_v39  ;;  %v2898_v38 = vld [vmem:[#allocation7 + $0x50] sm:$0xf] }
  0x57   :  { %866 = vmatpush.bf16.msrb.mxu2 %v2845_v40  ;;  %v2749_v22 = vor.u32 %v3569_v15, %v2746_v7  ;;  %v2677_v40 = vor.u32 %v3551_v29, %v2674_v31  ;;  %v3657_v15 = vld [vmem:[#allocation7 + $0x1e4] sm:$0xf]  ;;  %v3100_v7 = vld [vmem:[#allocation7 + $0x208] sm:$0xf0]  ;;  %v2980_v29 = vld [vmem:[#allocation7 + $0x118] sm:$0xf0] }
  0x58   :  { %854 = vmatpush.bf16.msra.mxu3 %v2773_v48  ;;  %v2794_v48 = vld [vmem:[#allocation4 + $0x298] sm:$0xf0]  ;;  %v2938_v31 = vld [vmem:[#allocation7 + $0xa0] sm:$0xf]  ;;  %v3612_v39 = vld [vmem:[#allocation7 + $0x74] sm:$0xf0] }
  0x59   :  { %841 = vmatpush.bf16.msra.mxu1 %v2709_v53  ;;  %v2722_v53 = vld [vmem:[#allocation4 + $0x208] sm:$0xf0]  ;;  %v2797_v58 = vor.u32 %v3581_v46, %v2794_v48  ;;  %v2939_v36 = vor.u32 %v3622_v32, %v2938_v31  ;;  %v3602_v46 = vld [vmem:[#allocation7 + $0x24] sm:$0xf0]  ;;  %v3597_v48 = vld [vmem:[#allocation7 + $0x4] sm:$0xf] }
  0x5a   :  { %829 = vmatpush.bf16.msra.mxu0 %v2637_v57  ;;  %v2669_v57 = vor.u32 %v3549_v43, %v2666_v45  ;;  %v2725_v63 = vor.u32 %v3563_v52, %v2722_v53  ;;  %v2900_v43 = vld [vmem:[#allocation7 + $0x78] sm:$0xf0]  ;;  %v2858_v45 = vld [vmem:[#allocation7] sm:$0xf]  ;;  %v2863_v52 = vor.u32 %v3597_v48, %v2860_v50  ;;  %v2946_v32 = vld [vmem:[#allocation7 + $0xa8] sm:$0xf] }
  0x5b   :  { %867 = vmatpush.bf16.msrb.mxu2 %v2837_v54  ;;  %v3595_v54 = vld [vmem:[#allocation4 + $0x304] sm:$0xf]  ;;  %v3380_v31 = vld [vmem:[#allocation7 + $0x438] sm:$0xf0]  ;;  %v3340_v48 = vld [vmem:[#allocation7 + $0x3e8] sm:$0xf0] }
  0x5c   :  { %855 = vmatpush.bf16.msra.mxu3 %v2765_v62  ;;  %v2658_v62 = vld [vmem:[#allocation4 + $0x188] sm:$0xf0]  ;;  %v2853_v2 = vor.u32 %v3595_v54, %v2850_v55  ;;  %v3148_v55 = vld [vmem:[#allocation7 + $0x260] sm:$0xf0]  ;;  %v3613_v50 = vld [vmem:[#allocation7 + $0x7c] sm:$0xf0] }
  0x5d   :  { %842 = vmatpush.bf16.msra.mxu1 %v2701_v3  ;;  %v3138_v3 = vld [vmem:[#allocation7 + $0x230] sm:$0xf]  ;;  %v2661_v9 = vor.u32 %v3547_v60, %v2658_v62  ;;  %v3668_v54 = vld [vmem:[#allocation7 + $0x23c] sm:$0xf]  ;;  %v3658_v60 = vld [vmem:[#allocation7 + $0x1ec] sm:$0xf] }
  0x5e   :  { %830 = vmatpush.bf16.msra.mxu0 %v2629_v8  ;;  %v3140_v8 = vld [vmem:[#allocation7 + $0x258] sm:$0xf0] }
  0x5f   :  { %868 = vmatpush.bf16.msrb.mxu2 %v2829_v4  ;;  %v3672_v4 = vld [vmem:[#allocation7 + $0x254] sm:$0xf0] }
  0x60   :  { %856 = vmatpush.bf16.msra.mxu3 %v2757_v12  ;;  %v3139_v11 = vor.u32 %v3672_v4, %v3138_v3  ;;  %v3143_v12 = vor.u32 %v3667_v5, %v3140_v8  ;;  %v3648_v3 = vld [vmem:[#allocation7 + $0x19c] sm:$0xf]  ;;  %v3068_v4 = vld [vmem:[#allocation7 + $0x1c0] sm:$0xf0]  ;;  %v3458_v5 = vld [vmem:[#allocation7 + $0x4b0] sm:$0xf] }
  0x61   :  { %843 = vmatpush.bf16.msra.mxu1 %v2693_v16  ;;  %v3099_v16 = vor.u32 %v3662_v14, %v3098_v13  ;;  %v3752_v8 = vld [vmem:[#allocation7 + $0x4d4] sm:$0xf0]  ;;  %v3071_v14 = vor.u32 %v3648_v3, %v3068_v4 }
  0x62   :  { %831 = vmatpush.bf16.msra.mxu0 %v2621_v18  ;;  %v3652_v18 = vld [vmem:[#allocation7 + $0x1b4] sm:$0xf0] }
  0x63   :  { %869 = vmatpush.bf16.msrb.mxu2 %v2821_v61  ;;  %v3103_v61 = vor.u32 %v3657_v15, %v3100_v7  ;;  %v3059_v21 = vor.u32 %v3652_v18, %v3058_v17  ;;  %v3026_v15 = vld [vmem:[#allocation7 + $0x148] sm:$0xf]  ;;  %v3643_v7 = vld [vmem:[#allocation7 + $0x16c] sm:$0xf0] }
  0x64   :  { %857 = vmatpush.bf16.msra.mxu3 %v2749_v22  ;;  %v3063_v22 = vor.u32 %v3647_v19, %v3060_v20  ;;  %v3027_v17 = vor.u32 %v3643_v7, %v3026_v15  ;;  %v3418_v19 = vld [vmem:[#allocation7 + $0x460] sm:$0xf]  ;;  %v3742_v20 = vld [vmem:[#allocation7 + $0x484] sm:$0xf0] }
  0x65   :  { %844 = vmatpush.bf16.msra.mxu1 %v2685_v27  ;;  %v2978_v27 = vld [vmem:[#allocation7 + $0xf0] sm:$0xf] }
  0x66   :  { %832 = vmatpush.bf16.msra.mxu0 %v2613_v30 }
  0x67   :  { %870 = vmatpush.bf16.msrb.mxu2 %v2813_v28  ;;  %v3632_v28 = vld [vmem:[#allocation7 + $0x114] sm:$0xf0] }
  0x68   :  { %858 = vmatpush.bf16.msra.mxu3 %v2741_v34  ;;  %v2979_v30 = vor.u32 %v3632_v28, %v2978_v27  ;;  %v2940_v34 = vld [vmem:[#allocation7 + $0xc8] sm:$0xf0]  ;;  %v2988_v27 = vld [vmem:[#allocation7 + $0x120] sm:$0xf0] }
  0x69   :  { %845 = vmatpush.bf16.msra.mxu1 %v2677_v40  ;;  %v2943_v37 = vor.u32 %v3617_v33, %v2940_v34  ;;  %v2899_v40 = vor.u32 %v3612_v39, %v2898_v38  ;;  %v3623_v33 = vld [vmem:[#allocation7 + $0xcc] sm:$0xf0]  ;;  %v3618_v38 = vld [vmem:[#allocation7 + $0xac] sm:$0xf]  ;;  %v2948_v39 = vld [vmem:[#allocation7 + $0xd0] sm:$0xf0] }
  0x6a   :  { %833 = vmatpush.bf16.msra.mxu0 %v2605_v44 }
  0x6b   :  { %871 = vmatpush.bf16.msrb.mxu2 %v2805_v41  ;;  %v3607_v41 = vld [vmem:[#allocation7 + $0x54] sm:$0xf] }
  0x6c   :  { %859 = vmatpush.bf16.msra.mxu3 %v2733_v49  ;;  %v2903_v44 = vor.u32 %v3607_v41, %v2900_v43  ;;  %v2859_v49 = vor.u32 %v3602_v46, %v2858_v45  ;;  %v3338_v43 = vld [vmem:[#allocation7 + $0x3c0] sm:$0xf]  ;;  %v3717_v45 = vld [vmem:[#allocation7 + $0x3c4] sm:$0xf] }
  0x6d   :  { %846 = vmatpush.bf16.msra.mxu1 %v2669_v57  ;;  %v3151_v57 = vor.u32 %v3668_v54, %v3148_v55 }
  0x6e   :  { %834 = vmatpush.bf16.msra.mxu0 %v2597_v59  ;;  %v3663_v59 = vld [vmem:[#allocation7 + $0x20c] sm:$0xf0] }
  0x6f   :  { %872 = vmatpush.bf16.msrb.mxu2 %v2797_v58  ;;  %v3106_v58 = vld [vmem:[#allocation7 + $0x1e8] sm:$0xf] }
  0x70   :  { %860 = vmatpush.bf16.msra.mxu3 %v2725_v63  ;;  %v3107_v62 = vor.u32 %v3663_v59, %v3106_v58  ;;  %v3108_v63 = vld [vmem:[#allocation7 + $0x210] sm:$0xf0]  ;;  %v3712_v58 = vld [vmem:[#allocation7 + $0x394] sm:$0xf0] }
  0x71   :  { %847 = vmatpush.bf16.msra.mxu1 %v2661_v9  ;;  %835 = vmatmul.bf16.vlgmr.msra.gmra.mxu0 %v3936_v56  ;;  %v3018_v56 = vld [vmem:[#allocation7 + $0x140] sm:$0xf]  ;;  %v3747_v9 = vld [vmem:[#allocation7 + $0x4b4] sm:$0xf] }
  0x72   :  { %886 = vmatpush.bf16.msrb.mxu0 %v2853_v2  ;;  %v3019_v25 = vor.u32 %v3642_v23, %v3018_v56  ;;  %v3111_v2 = vor.u32 %v3658_v60, %v3108_v63  ;;  %v3420_v56 = vld [vmem:[#allocation7 + $0x488] sm:$0xf0]  ;;  %v2986_v23 = vld [vmem:[#allocation7 + $0xf8] sm:$0xf]  ;;  %v3707_v59 = vld [vmem:[#allocation7 + $0x374] sm:$0xf] }
  0x73   :  { %861 = vmatmul.bf16.vlgmr.msra.gmra.mxu3 %v3958_v35  ;;  %873 = vmatpush.bf16.msrb.mxu2 %v2789_v10  ;;  %v3637_v35 = vld [vmem:[#allocation7 + $0x144] sm:$0xf]  ;;  %v3460_v10 = vld [vmem:[#allocation7 + $0x4d8] sm:$0xf0]  ;;  %v2866_v63 = vld [vmem:[#allocation7 + $0x8] sm:$0xf] }
  0x74   :  { %848 = vmatmul.bf16.vlgmr.msra.gmra.mxu1 %v3940_v6  ;;  %v3023_v26 = vor.u32 %v3637_v35, %v3020_v24  ;;  %v3627_v6 = vld [vmem:[#allocation7 + $0xf4] sm:$0xf]  ;;  %v3463_v13 = vor.u32 %v3747_v9, %v3460_v10  ;;  %v3633_v35 = vld [vmem:[#allocation7 + $0x11c] sm:$0xf0] }
  0x75   :  { %1858 = vmatpush.bf16.msrb.mxu1 %v3139_v11  ;;  %v3067_v11 = vor.u32 %v3653_v1, %v3066_v0  ;;  %v3603_v0 = vld [vmem:[#allocation7 + $0x2c] sm:$0xf0]  ;;  %v3979_v1 = vld [vmem:[%s4186_s2] sm:$0x3]  ;;  %v2868_v9 = vld [vmem:[#allocation7 + $0x30] sm:$0xf0] }
  0x76   :  { %1884 = vmatpush.bf16.msra.mxu0 %v3143_v12  ;;  %874 = vmatmul.bf16.vlgmr.msrb.gmra.mxu2 %v3960_v42  ;;  %v2983_v42 = vor.u32 %v3627_v6, %v2980_v29  ;;  %v3459_v12 = vor.u32 %v3752_v8, %v3458_v5  ;;  %v3378_v6 = vld [vmem:[#allocation7 + $0x410] sm:$0xf]  ;;  %v3732_v29 = vld [vmem:[#allocation7 + $0x434] sm:$0xf0]  ;;  %v2867_v5 = vor.u32 %v3603_v0, %v2866_v63  ;;  %v3598_v8 = vld [vmem:[#allocation7 + $0xc] sm:$0xf] }
  0x77   :  { %1897 = vmatpush.bf16.msra.mxu2 %v3463_v13  ;;  %v2871_v10 = vor.u32 %v3598_v8, %v2868_v9  ;;  %v3702_v13 = vld [vmem:[#allocation7 + $0x344] sm:$0xf0]  ;;  %v188_v15 = vperm.slane %v3979_v1, 0  ;;  %v3348_v63 = vld [vmem:[#allocation7 + $0x3f0] sm:$0xf0]  ;;  %s2451_s2 = sshll.u32 %s4195_s11, 4  ;;  %s2452_s2 = int_to_ptr.hbm [resolvable:$true] %s2451_s2 }
  0x78   :  { %1871 = vmatpush.bf16.msrb.mxu3 %v3459_v12  ;;  %v3258_v12 = vld [vmem:[#allocation7 + $0x320] sm:$0xf]  ;;  %v3156_v8 = vld [vmem:[#allocation7 + $0x268] sm:$0xf0] }
  0x79   :  { %1859 = vmatpush.bf16.msrb.mxu1 %v3099_v16  ;;  %v3638_v16 = vld [vmem:[#allocation7 + $0x14c] sm:$0xf]  ;;  %v3259_v7 = vor.u32 %v3702_v13, %v3258_v12 }
  0x7a   :  { %1885 = vmatpush.bf16.msra.mxu0 %v3103_v61  ;;  %v3028_v61 = vld [vmem:[#allocation7 + $0x170] sm:$0xf0] }
  0x7b   :  { %v3031_v18 = vor.u32 %v3638_v16, %v3028_v61  ;;  %v3260_v16 = vld [vmem:[#allocation7 + $0x348] sm:$0xf0] }
  0x7d   :  { %1860 = vmatpush.bf16.msrb.mxu1 %v3059_v21  ;;  %v3737_v21 = vld [vmem:[#allocation7 + $0x464] sm:$0xf] }
  0x7e   :  { %1886 = vmatpush.bf16.msra.mxu0 %v3063_v22  ;;  %v3419_v22 = vor.u32 %v3742_v20, %v3418_v19  ;;  %v3423_v24 = vor.u32 %v3737_v21, %v3420_v56  ;;  %v3692_v19 = vld [vmem:[#allocation7 + $0x2f4] sm:$0xf0]  ;;  %v3687_v20 = vld [vmem:[#allocation7 + $0x2d4] sm:$0xf]  ;;  %v3220_v56 = vld [vmem:[#allocation7 + $0x2f8] sm:$0xf0] }
  0x80   :  { %1872 = vmatpush.bf16.msrb.mxu3 %v3419_v22  ;;  %1898 = vmatpush.bf16.msra.mxu2 %v3423_v24  ;;  %v3178_v24 = vld [vmem:[#allocation7 + $0x280] sm:$0xf] }
  0x81   :  { %1861 = vmatpush.bf16.msrb.mxu1 %v3019_v25  ;;  %2855 = vmatmul.msk.bf16.vlgmr.msrb.gmra.mxu0 %vm706_vm0, %v3951_v47  ;;  %v3673_v47 = vld [vmem:[#allocation7 + $0x25c] sm:$0xf0]  ;;  %v2987_v25 = vor.u32 %v3633_v35, %v2986_v23  ;;  %v3223_v35 = vor.u32 %v3687_v20, %v3220_v56  ;;  %v3114_v20 = vld [vmem:[#allocation7 + $0x1f0] sm:$0xf] }
  0x82   :  { %1887 = vmatpush.bf16.msra.mxu0 %v3023_v26  ;;  %v3147_v53 = vor.u32 %v3673_v47, %v3146_v51  ;;  %v3628_v26 = vld [vmem:[#allocation7 + $0xfc] sm:$0xf]  ;;  %v3343_v51 = vor.u32 %v3717_v45, %v3340_v48  ;;  %v3733_v48 = vld [vmem:[#allocation7 + $0x43c] sm:$0xf0] }
  0x83   :  { %v2991_v28 = vor.u32 %v3628_v26, %v2988_v27  ;;  %v3677_v26 = vld [vmem:[#allocation7 + $0x284] sm:$0xf] }
  0x85   :  { %1862 = vmatpush.bf16.msrb.mxu1 %v2979_v30  ;;  %v3727_v30 = vld [vmem:[#allocation7 + $0x414] sm:$0xf] }
  0x86   :  { %1888 = vmatpush.bf16.msra.mxu0 %v2983_v42  ;;  %v3379_v42 = vor.u32 %v3732_v29, %v3378_v6  ;;  %v3180_v6 = vld [vmem:[#allocation7 + $0x2a8] sm:$0xf0]  ;;  %v3466_v29 = vld [vmem:[#allocation7 + $0x4b8] sm:$0xf] }
  0x88   :  { %1873 = vmatpush.bf16.msrb.mxu3 %v3379_v42  ;;  %v3183_v42 = vor.u32 %v3677_v26, %v3180_v6  ;;  %v3074_v6 = vld [vmem:[#allocation7 + $0x1a0] sm:$0xf] }
  0x89   :  { %1863 = vmatpush.bf16.msrb.mxu1 %v2939_v36  ;;  %v3383_v36 = vor.u32 %v3727_v30, %v3380_v31  ;;  %v3753_v30 = vld [vmem:[#allocation7 + $0x4dc] sm:$0xf0] }
  0x8a   :  { %1889 = vmatpush.bf16.msra.mxu0 %v2943_v37  ;;  %v2947_v37 = vor.u32 %v3623_v33, %v2946_v32  ;;  %v3467_v31 = vor.u32 %v3753_v30, %v3466_v29  ;;  %v3748_v32 = vld [vmem:[#allocation7 + $0x4bc] sm:$0xf]  ;;  %v3468_v33 = vld [vmem:[#allocation7 + $0x4e0] sm:$0xf0] }
  0x8b   :  { %1899 = vmatpush.bf16.msra.mxu2 %v3383_v36  ;;  %v3471_v36 = vor.u32 %v3748_v32, %v3468_v33  ;;  %v3649_v32 = vld [vmem:[#allocation7 + $0x1a4] sm:$0xf]  ;;  %v3076_v33 = vld [vmem:[#allocation7 + $0x1c8] sm:$0xf0] }
  0x8d   :  { %1864 = vmatpush.bf16.msrb.mxu1 %v2899_v40  ;;  %v2951_v40 = vor.u32 %v3618_v38, %v2948_v39  ;;  %v3426_v38 = vld [vmem:[#allocation7 + $0x468] sm:$0xf]  ;;  %v3743_v39 = vld [vmem:[#allocation7 + $0x48c] sm:$0xf0] }
  0x8e   :  { %1890 = vmatpush.bf16.msra.mxu0 %v2903_v44  ;;  %v3722_v44 = vld [vmem:[#allocation7 + $0x3e4] sm:$0xf0] }
  0x8f   :  { %v3339_v46 = vor.u32 %v3722_v44, %v3338_v43  ;;  %1900 = vmatpush.bf16.msra.mxu2 %v3343_v51  ;;  %v3428_v43 = vld [vmem:[#allocation7 + $0x490] sm:$0xf0] }
  0x91   :  { %1865 = vmatpush.bf16.msrb.mxu1 %v2859_v49  ;;  %v2906_v49 = vld [vmem:[#allocation7 + $0x58] sm:$0xf]  ;;  %1874 = vmatpush.bf16.msrb.mxu3 %v3339_v46 }
  0x92   :  { %1891 = vmatpush.bf16.msra.mxu0 %v2863_v52  ;;  %v2907_v47 = vor.u32 %v3613_v50, %v2906_v49  ;;  %v3608_v52 = vld [vmem:[#allocation7 + $0x5c] sm:$0xf]  ;;  %v3386_v46 = vld [vmem:[#allocation7 + $0x418] sm:$0xf] }
  0x93   :  { %v3728_v49 = vld [vmem:[#allocation7 + $0x41c] sm:$0xf]  ;;  %v3387_v51 = vor.u32 %v3733_v48, %v3386_v46  ;;  %v3644_v48 = vld [vmem:[#allocation7 + $0x174] sm:$0xf0] }
  0x95   :  { %1910 = vmatpush.bf16.msra.mxu1 %v3147_v53  ;;  %v2908_v53 = vld [vmem:[#allocation7 + $0x80] sm:$0xf0] }
  0x96   :  { %1936 = vmatpush.bf16.msrb.mxu0 %v3151_v57  ;;  %v2911_v55 = vor.u32 %v3608_v52, %v2908_v53  ;;  %v3298_v57 = vld [vmem:[#allocation7 + $0x370] sm:$0xf] }
  0x97   :  { %v3299_v60 = vor.u32 %v3712_v58, %v3298_v57  ;;  %v3346_v58 = vld [vmem:[#allocation7 + $0x3c8] sm:$0xf] }
  0x99   :  { %1911 = vmatpush.bf16.msra.mxu1 %v3107_v62  ;;  %v3300_v62 = vld [vmem:[#allocation7 + $0x398] sm:$0xf0]  ;;  %1875 = vmatpush.bf16.msrb.mxu3 %v3299_v60  ;;  %v3718_v60 = vld [vmem:[#allocation7 + $0x3cc] sm:$0xf] }
  0x9a   :  { %1937 = vmatpush.bf16.msrb.mxu0 %v3111_v2  ;;  %v3303_v4 = vor.u32 %v3707_v59, %v3300_v62  ;;  %v3723_v59 = vld [vmem:[#allocation7 + $0x3ec] sm:$0xf0] }
  0x9b   :  { %v3347_v62 = vor.u32 %v3723_v59, %v3346_v58 }
  0x9c   :  { %1901 = vmatpush.bf16.msra.mxu2 %v3303_v4  ;;  %v3674_v4 = vld [vmem:[#allocation7 + $0x264] sm:$0xf0] }
  0x9d   :  { %1912 = vmatpush.bf16.msra.mxu1 %v3067_v11  ;;  %1876 = vmatpush.bf16.msrb.mxu3 %v3259_v7 }
  0x9e   :  { %1938 = vmatpush.bf16.msrb.mxu0 %v3071_v14  ;;  %v3697_v14 = vld [vmem:[#allocation7 + $0x324] sm:$0xf] }
  0x9f   :  { %v3263_v61 = vor.u32 %v3697_v14, %v3260_v16  ;;  %v3708_v14 = vld [vmem:[#allocation7 + $0x37c] sm:$0xf] }
  0xa1   :  { %1913 = vmatpush.bf16.msra.mxu1 %v3027_v17  ;;  %1902 = vmatpush.bf16.msra.mxu2 %v3263_v61 }
  0xa2   :  { %1939 = vmatpush.bf16.msrb.mxu0 %v3031_v18  ;;  %v3218_v18 = vld [vmem:[#allocation7 + $0x2d0] sm:$0xf] }
  0xa3   :  { %v3219_v22 = vor.u32 %v3692_v19, %v3218_v18 }
  0xa5   :  { %1914 = vmatpush.bf16.msra.mxu1 %v2987_v25  ;;  %1877 = vmatpush.bf16.msrb.mxu3 %v3219_v22  ;;  %v3682_v25 = vld [vmem:[#allocation7 + $0x2a4] sm:$0xf0]  ;;  %v3659_v22 = vld [vmem:[#allocation7 + $0x1f4] sm:$0xf] }
  0xa6   :  { %1940 = vmatpush.bf16.msrb.mxu0 %v2991_v28  ;;  %1903 = vmatpush.bf16.msra.mxu2 %v3223_v35  ;;  %v3179_v28 = vor.u32 %v3682_v25, %v3178_v24  ;;  %v3116_v35 = vld [vmem:[#allocation7 + $0x218] sm:$0xf0]  ;;  %v3266_v24 = vld [vmem:[#allocation7 + $0x328] sm:$0xf]  ;;  %v3703_v25 = vld [vmem:[#allocation7 + $0x34c] sm:$0xf0] }
  0xa7   :  { %v3267_v26 = vor.u32 %v3703_v25, %v3266_v24  ;;  %v3162_v24 = vld [vmem:[#allocation7 + $0x248] sm:$0xf]  ;;  %v3675_v25 = vld [vmem:[#allocation7 + $0x26c] sm:$0xf0] }
  0xa9   :  { %1915 = vmatpush.bf16.msra.mxu1 %v2947_v37  ;;  %1878 = vmatpush.bf16.msrb.mxu3 %v3179_v28  ;;  %v3268_v28 = vld [vmem:[#allocation7 + $0x350] sm:$0xf0] }
  0xaa   :  { %1941 = vmatpush.bf16.msrb.mxu0 %v2951_v40  ;;  %1904 = vmatpush.bf16.msra.mxu2 %v3183_v42  ;;  %v3738_v40 = vld [vmem:[#allocation7 + $0x46c] sm:$0xf]  ;;  %v3119_v42 = vor.u32 %v3659_v22, %v3116_v35  ;;  %v3604_v22 = vld [vmem:[#allocation7 + $0x34] sm:$0xf0]  ;;  %v2876_v35 = vld [vmem:[#allocation7 + $0x38] sm:$0xf0] }
  0xab   :  { %v3431_v44 = vor.u32 %v3738_v40, %v3428_v43  ;;  %v3034_v40 = vld [vmem:[#allocation7 + $0x150] sm:$0xf] }
  0xac   :  { %v3035_v58 = vor.u32 %v3644_v48, %v3034_v40  ;;  %v3650_v48 = vld [vmem:[#allocation7 + $0x1ac] sm:$0xf] }
  0xad   :  { %1916 = vmatpush.bf16.msra.mxu1 %v2907_v47  ;;  %1923 = vmatpush.bf16.msra.mxu3 %v3467_v31  ;;  %v3388_v47 = vld [vmem:[#allocation7 + $0x440] sm:$0xf0]  ;;  %v3654_v31 = vld [vmem:[#allocation7 + $0x1c4] sm:$0xf0] }
  0xae   :  { %v719_v34 = vpop.f32.mrf.mxu0  ;;  %1942 = vmatpush.bf16.msrb.mxu0 %v2911_v55  ;;  %1949 = vmatpush.bf16.msrb.mxu2 %v3471_v36  ;;  %v3391_v55 = vor.u32 %v3728_v49, %v3388_v47  ;;  %v3693_v36 = vld [vmem:[#allocation7 + $0x2fc] sm:$0xf0]  ;;  %v3639_v49 = vld [vmem:[#allocation7 + $0x154] sm:$0xf]  ;;  %v3683_v47 = vld [vmem:[#allocation7 + $0x2ac] sm:$0xf0] }
  0xaf   :  { %v720_v21 = vadd.f32 %v719_v34, %v188_v15  ;;  %v3308_v15 = vld [vmem:[#allocation7 + $0x3a0] sm:$0xf0] }
  0xb0   :  { %v3311_v61 = vor.u32 %v3708_v14, %v3308_v15  ;;  %v2914_v14 = vld [vmem:[#allocation7 + $0x60] sm:$0xf]  ;;  %v3614_v15 = vld [vmem:[#allocation7 + $0x84] sm:$0xf0] }
  0xb1   :  { %v3972_v41 = vpop.f32.mrf.mxu1  ;;  %1917 = vmatpush.bf16.msra.mxu1 %v2867_v5  ;;  %v3669_v5 = vld [vmem:[#allocation7 + $0x244] sm:$0xf] }
  0xb2   :  { %1943 = vmatpush.bf16.msrb.mxu0 %v2871_v10  ;;  %v733_v27 = vadd.f32 %v3972_v41, %v720_v21  ;;  %v3427_v41 = vor.u32 %v3743_v39, %v3426_v38  ;;  %1950 = vmatpush.bf16.msrb.mxu2 %v3431_v44  ;;  %v3306_v10 = vld [vmem:[#allocation7 + $0x378] sm:$0xf]  ;;  %v3159_v18 = vor.u32 %v3669_v5, %v3156_v8  ;;  %v3228_v39 = vld [vmem:[#allocation7 + $0x300] sm:$0xf0]  ;;  %v2954_v5 = vld [vmem:[#allocation7 + $0xb0] sm:$0xf] }
  0xb3   :  { %v3664_v21 = vld [vmem:[#allocation7 + $0x214] sm:$0xf0]  ;;  %v3075_v44 = vor.u32 %v3654_v31, %v3074_v6  ;;  %v3163_v31 = vor.u32 %v3675_v25, %v3162_v24  ;;  %v3620_v25 = vld [vmem:[#allocation7 + $0xbc] sm:$0xf] }
  0xb4   :  { %1924 = vmatpush.bf16.msra.mxu3 %v3427_v41  ;;  %v3115_v30 = vor.u32 %v3664_v21, %v3114_v20  ;;  %v3624_v8 = vld [vmem:[#allocation7 + $0xd4] sm:$0xf0]  ;;  %v2874_v21 = vld [vmem:[#allocation7 + $0x10] sm:$0xf] }
  0xb5   :  { %v3974_v54 = vpop.f32.mrf.mxu2  ;;  %v2962_v24 = vld [vmem:[#allocation7 + $0xb8] sm:$0xf] }
  0xb6   :  { %v758_v2 = vpop.f32.mrf.mxu3  ;;  %v721_v3 = vpop.f32.mrf.mxu0  ;;  %v746_v37 = vadd.f32 %v3974_v54, %v733_v27  ;;  %1951 = vmatpush.bf16.msrb.mxu2 %v3391_v55  ;;  %v3698_v27 = vld [vmem:[#allocation7 + $0x32c] sm:$0xf]  ;;  %v3188_v55 = vld [vmem:[#allocation7 + $0x2b0] sm:$0xf0] }
  0xb7   :  { %v3351_v3 = vor.u32 %v3718_v60, %v3348_v63  ;;  %v3271_v29 = vor.u32 %v3698_v27, %v3268_v28  ;;  %v2994_v60 = vld [vmem:[#allocation7 + $0x100] sm:$0xf]  ;;  %v3629_v63 = vld [vmem:[#allocation7 + $0x104] sm:$0xf]  ;;  %v3164_v27 = vld [vmem:[#allocation7 + $0x270] sm:$0xf0] }
  0xb8   :  { %v759_v45 = vadd.f32 %v758_v2, %v746_v37  ;;  %1925 = vmatpush.bf16.msra.mxu3 %v3387_v51  ;;  %v3154_v2 = vld [vmem:[#allocation7 + $0x240] sm:$0xf]  ;;  %v3688_v37 = vld [vmem:[#allocation7 + $0x2dc] sm:$0xf]  ;;  %v3186_v51 = vld [vmem:[#allocation7 + $0x288] sm:$0xf] }
  0xb9   :  { %v734_v11 = vpop.f32.mrf.mxu1  ;;  %v3231_v43 = vor.u32 %v3688_v37, %v3228_v39  ;;  %v3665_v37 = vld [vmem:[#allocation7 + $0x21c] sm:$0xf0]  ;;  %v3124_v39 = vld [vmem:[#allocation7 + $0x220] sm:$0xf0] }
  0xba   :  { %1952 = vmatpush.bf16.msrb.mxu2 %v3351_v3  ;;  %v3713_v11 = vld [vmem:[#allocation7 + $0x39c] sm:$0xf0] }
  0xbb   :  { %v3307_v13 = vor.u32 %v3713_v11, %v3306_v10  ;;  %v2956_v10 = vld [vmem:[#allocation7 + $0xd8] sm:$0xf0] }
  0xbc   :  { %1926 = vmatpush.bf16.msra.mxu3 %v3347_v62  ;;  %v3634_v62 = vld [vmem:[#allocation7 + $0x124] sm:$0xf0] }
  0xbd   :  { %v747_v17 = vpop.f32.mrf.mxu2  ;;  %v2995_v3 = vor.u32 %v3634_v62, %v2994_v60  ;;  %v3042_v60 = vld [vmem:[#allocation7 + $0x158] sm:$0xf]  ;;  %v3645_v62 = vld [vmem:[#allocation7 + $0x17c] sm:$0xf0] }
  0xbe   :  { %v760_v23 = vpop.f32.mrf.mxu3  ;;  %v3155_v17 = vor.u32 %v3674_v4, %v3154_v2  ;;  %1953 = vmatpush.bf16.msrb.mxu2 %v3311_v61  ;;  %v2916_v61 = vld [vmem:[#allocation7 + $0x88] sm:$0xf0] }
  0xc0   :  { %1927 = vmatpush.bf16.msra.mxu3 %v3307_v13 }
  0xc2   :  { %1954 = vmatpush.bf16.msrb.mxu2 %v3271_v29  ;;  %v2875_v29 = vor.u32 %v3604_v22, %v2874_v21 }
  0xc4   :  { %1928 = vmatpush.bf16.msra.mxu3 %v3267_v26  ;;  %v3670_v26 = vld [vmem:[#allocation7 + $0x24c] sm:$0xf] }
  0xc5   :  { %v797_v34 = vpop.f32.mrf.mxu2 }
  0xc6   :  { %1955 = vmatpush.bf16.msrb.mxu2 %v3231_v43  ;;  %v3082_v43 = vld [vmem:[#allocation7 + $0x1a8] sm:$0xf] }
  0xcd   :  { %v799_v53 = vpop.f32.mrf.mxu2 }
  0xce   :  { %v771_v50 = vpop.f32.mrf.mxu0  ;;  %v3187_v53 = vor.u32 %v3683_v47, %v3186_v51 }
  0xcf   :  { %v772_v52 = vadd.f32 %v771_v50, %v759_v45  ;;  %v3079_v45 = vor.u32 %v3649_v32, %v3076_v33  ;;  %v3036_v50 = vld [vmem:[#allocation7 + $0x178] sm:$0xf0]  ;;  %v3167_v32 = vor.u32 %v3670_v26, %v3164_v27  ;;  %v3122_v33 = vld [vmem:[#allocation7 + $0x1f8] sm:$0xf]  ;;  %v2964_v26 = vld [vmem:[#allocation7 + $0xe0] sm:$0xf0] }
  0xd0   :  { %v3039_v59 = vor.u32 %v3639_v49, %v3036_v50  ;;  %v3123_v40 = vor.u32 %v3665_v37, %v3122_v33  ;;  %v3084_v49 = vld [vmem:[#allocation7 + $0x1d0] sm:$0xf0]  ;;  %v2922_v33 = vld [vmem:[#allocation7 + $0x68] sm:$0xf] }
  0xd1   :  { %v784_v54 = vpop.f32.mrf.mxu1  ;;  %v2924_v37 = vld [vmem:[#allocation7 + $0x90] sm:$0xf0] }
  0xd2   :  { %v785_v57 = vadd.f32 %v784_v54, %v772_v52  ;;  %v3678_v52 = vld [vmem:[#allocation7 + $0x28c] sm:$0xf] }
  0xd3   :  { %v3191_v54 = vor.u32 %v3678_v52, %v3188_v55  ;;  %v3474_v55 = vld [vmem:[#allocation7 + $0x4c0] sm:$0xf] }
  0xd4   :  { %v798_v0 = vadd.f32 %v797_v34, %v785_v57  ;;  %v3226_v34 = vld [vmem:[#allocation7 + $0x2d8] sm:$0xf]  ;;  %v189_v57 = vperm.slane %v3979_v1, 1 }
  0xd5   :  { %v3227_v38 = vor.u32 %v3693_v36, %v3226_v34  ;;  %1956 = vmatpush.bf16.msrb.mxu2 %v3191_v54  ;;  %v3754_v54 = vld [vmem:[#allocation7 + $0x4e4] sm:$0xf0] }
  0xd6   :  { %v892_v9 = vmul.f32 0.2, %v798_v0  ;;  %v773_v12 = vpop.f32.mrf.mxu0  ;;  %v810_v19 = vpop.f32.mrf.mxu3 }
  0xd7   :  { %1929 = vmatpush.bf16.msra.mxu3 %v3227_v38  ;;  %v811_v2 = vadd.f32 %v810_v19, %v189_v57  ;;  %v2955_v12 = vor.u32 %v3624_v8, %v2954_v5  ;;  %v2915_v19 = vor.u32 %v3614_v15, %v2914_v14  ;;  %v3660_v38 = vld [vmem:[#allocation7 + $0x1fc] sm:$0xf]  ;;  %v3749_v57 = vld [vmem:[#allocation7 + $0x4c4] sm:$0xf]  ;;  %v3434_v5 = vld [vmem:[#allocation7 + $0x470] sm:$0xf] }
  0xd8   :  { %v894_v7 = vmax.f32 %v798_v0, %v892_v9  ;;  %v2996_v0 = vld [vmem:[#allocation7 + $0x128] sm:$0xf0]  ;;  %v3619_v9 = vld [vmem:[#allocation7 + $0xb4] sm:$0xf]  ;;  %v3744_v8 = vld [vmem:[#allocation7 + $0x494] sm:$0xf0] }
  0xd9   :  { %v3984_v16 = vpop.f32.mrf.mxu2  ;;  %v786_v56 = vpop.f32.mrf.mxu1  ;;  %v2999_v4 = vor.u32 %v3629_v63, %v2996_v0  ;;  %v2959_v13 = vor.u32 %v3619_v9, %v2956_v10  ;;  %v3640_v63 = vld [vmem:[#allocation7 + $0x15c] sm:$0xf]  ;;  %v3044_v0 = vld [vmem:[#allocation7 + $0x180] sm:$0xf0]  ;;  %v3043_v10 = vor.u32 %v3645_v62, %v3042_v60  ;;  %v3635_v15 = vld [vmem:[#allocation7 + $0x12c] sm:$0xf0] }
  0xda   :  { %v3986_v23 = vpack.c.bf16 %v894_v7, %v894_v7  ;;  %v824_v11 = vadd.f32 %v3984_v16, %v811_v2  ;;  %v3609_v7 = vld [vmem:[#allocation7 + $0x64] sm:$0xf]  ;;  %v3599_v56 = vld [vmem:[#allocation7 + $0x14] sm:$0xf]  ;;  %v3274_v60 = vld [vmem:[#allocation7 + $0x330] sm:$0xf] }
  0xdb   :  { %1930 = vmatpush.bf16.msra.mxu3 %v3187_v53  ;;  %v2919_v20 = vor.u32 %v3609_v7, %v2916_v61  ;;  %v3087_v53 = vor.u32 %v3650_v48, %v3084_v49  ;;  %v3630_v7 = vld [vmem:[#allocation7 + $0x10c] sm:$0xf]  ;;  %v3004_v61 = vld [vmem:[#allocation7 + $0x130] sm:$0xf0]  ;;  %v2882_v48 = vld [vmem:[#allocation7 + $0x18] sm:$0xf] }
  0xdc   :  { %1866 = vmatmul.bf16.vlgmr.msrb.gmra.mxu1 %v3986_v23  ;;  %1892 = vmatmul.bf16.vlgmr.msra.gmra.mxu0 %v3986_v23  ;;  %v3007_v22 = vor.u32 %v3630_v7, %v3004_v61  ;;  %v3605_v49 = vld [vmem:[#allocation7 + $0x3c] sm:$0xf0]  ;;  %v3704_v62 = vld [vmem:[#allocation7 + $0x354] sm:$0xf0]  ;;  %v3689_v7 = vld [vmem:[#allocation7 + $0x2e4] sm:$0xf] }
  0xdd   :  { %1962 = vmatpush.bf16.msrb.mxu1 %v3155_v17  ;;  %1988 = vmatpush.bf16.msra.mxu0 %v3159_v18  ;;  %v3236_v61 = vld [vmem:[#allocation7 + $0x308] sm:$0xf0] }
  0xde   :  { %v812_v46 = vpop.f32.mrf.mxu3 }
  0xdf   :  { %v3655_v46 = vld [vmem:[#allocation7 + $0x1cc] sm:$0xf0] }
  0xe0   :  { %v3083_v52 = vor.u32 %v3655_v46, %v3082_v43  ;;  %v3709_v43 = vld [vmem:[#allocation7 + $0x384] sm:$0xf]  ;;  %v3316_v46 = vld [vmem:[#allocation7 + $0x3a8] sm:$0xf0] }
  0xe1   :  { %v825_v41 = vpop.f32.mrf.mxu2  ;;  %1963 = vmatpush.bf16.msrb.mxu1 %v3115_v30  ;;  %1989 = vmatpush.bf16.msra.mxu0 %v3119_v42  ;;  %v2879_v30 = vor.u32 %v3599_v56, %v2876_v35  ;;  %v3729_v56 = vld [vmem:[#allocation7 + $0x424] sm:$0xf]  ;;  %v3396_v35 = vld [vmem:[#allocation7 + $0x448] sm:$0xf0] }
  0xe2   :  { %v3127_v41 = vor.u32 %v3660_v38, %v3124_v39 }
  0xe5   :  { %1964 = vmatpush.bf16.msrb.mxu1 %v3075_v44  ;;  %1990 = vmatpush.bf16.msra.mxu0 %v3079_v45 }
  0xe9   :  { %1965 = vmatpush.bf16.msrb.mxu1 %v3035_v58  ;;  %1991 = vmatpush.bf16.msra.mxu0 %v3039_v59  ;;  %v3476_v59 = vld [vmem:[#allocation7 + $0x4e8] sm:$0xf0] }
  0xec   :  { %1918 = vmatmul.bf16.vlgmr.msra.gmra.mxu1 %v3986_v23  ;;  %1944 = vmatmul.bf16.vlgmr.msrb.gmra.mxu0 %v3986_v23 }
  0xed   :  { %1966 = vmatpush.bf16.msrb.mxu1 %v2995_v3  ;;  %1992 = vmatpush.bf16.msra.mxu0 %v2999_v4  ;;  %v3475_v3 = vor.u32 %v3754_v54, %v3474_v55  ;;  %v3479_v4 = vor.u32 %v3749_v57, %v3476_v59  ;;  %v3172_v55 = vld [vmem:[#allocation7 + $0x278] sm:$0xf0]  ;;  %v3319_v57 = vor.u32 %v3709_v43, %v3316_v46  ;;  %v3636_v46 = vld [vmem:[#allocation7 + $0x134] sm:$0xf0] }
  0xee   :  { %v836_v1 = vpop.f32.mrf.mxu0  ;;  %v3740_v43 = vld [vmem:[#allocation7 + $0x47c] sm:$0xf] }
  0xef   :  { %v837_v18 = vadd.f32 %v836_v1, %v824_v11  ;;  %v3047_v1 = vor.u32 %v3640_v63, %v3044_v0  ;;  %v3739_v11 = vld [vmem:[#allocation7 + $0x474] sm:$0xf] }
  0xf1   :  { %v849_v17 = vpop.f32.mrf.mxu1  ;;  %1967 = vmatpush.bf16.msrb.mxu1 %v2955_v12  ;;  %1993 = vmatpush.bf16.msra.mxu0 %v2959_v13  ;;  %v3436_v12 = vld [vmem:[#allocation7 + $0x498] sm:$0xf0]  ;;  %v3002_v13 = vld [vmem:[#allocation7 + $0x108] sm:$0xf] }
  0xf2   :  { %v850_v6 = vadd.f32 %v849_v17, %v837_v18  ;;  %v3435_v17 = vor.u32 %v3744_v8, %v3434_v5  ;;  %v3439_v18 = vor.u32 %v3739_v11, %v3436_v12  ;;  %v3003_v21 = vor.u32 %v3635_v15, %v3002_v13  ;;  %v3666_v5 = vld [vmem:[#allocation7 + $0x224] sm:$0xf0]  ;;  %v3661_v8 = vld [vmem:[#allocation7 + $0x204] sm:$0xf]  ;;  %v3234_v12 = vld [vmem:[#allocation7 + $0x2e0] sm:$0xf] }
  0xf3   :  { %v3694_v13 = vld [vmem:[#allocation7 + $0x304] sm:$0xf0] }
  0xf5   :  { %1968 = vmatpush.bf16.msrb.mxu1 %v2915_v19  ;;  %1994 = vmatpush.bf16.msra.mxu0 %v2919_v20  ;;  %v3394_v19 = vld [vmem:[#allocation7 + $0x420] sm:$0xf]  ;;  %v3734_v20 = vld [vmem:[#allocation7 + $0x444] sm:$0xf0] }
  0xf6   :  { %v862_v16 = vpop.f32.mrf.mxu3  ;;  %v838_v28 = vpop.f32.mrf.mxu0  ;;  %v3395_v27 = vor.u32 %v3734_v20, %v3394_v19  ;;  %v3651_v19 = vld [vmem:[#allocation7 + $0x1b4] sm:$0xf]  ;;  %v3092_v20 = vld [vmem:[#allocation7 + $0x1d8] sm:$0xf0] }
  0xf7   :  { %v863_v34 = vadd.f32 %v862_v16, %v850_v6  ;;  %v3625_v16 = vld [vmem:[#allocation7 + $0xdc] sm:$0xf0]  ;;  %v3399_v28 = vor.u32 %v3729_v56, %v3396_v35  ;;  %v3354_v6 = vld [vmem:[#allocation7 + $0x3d0] sm:$0xf]  ;;  %v3684_v35 = vld [vmem:[#allocation7 + $0x2b4] sm:$0xf0] }
  0xf8   :  { %v3194_v56 = vld [vmem:[#allocation7 + $0x290] sm:$0xf] }
  0xf9   :  { %v875_v42 = vpop.f32.mrf.mxu2  ;;  %v851_v36 = vpop.f32.mrf.mxu1  ;;  %1969 = vmatpush.bf16.msrb.mxu1 %v2875_v29  ;;  %1995 = vmatpush.bf16.msra.mxu0 %v2879_v30  ;;  %v3724_v29 = vld [vmem:[#allocation7 + $0x3f4] sm:$0xf0]  ;;  %v2963_v30 = vor.u32 %v3625_v16, %v2962_v24  ;;  %v3679_v24 = vld [vmem:[#allocation7 + $0x294] sm:$0xf] }
  0xfa   :  { %v876_v44 = vadd.f32 %v875_v42, %v863_v34  ;;  %v2967_v42 = vor.u32 %v3620_v25, %v2964_v26  ;;  %v3615_v34 = vld [vmem:[#allocation7 + $0x8c] sm:$0xf0]  ;;  %v3610_v36 = vld [vmem:[#allocation7 + $0x6c] sm:$0xf]  ;;  %v3355_v38 = vor.u32 %v3724_v29, %v3354_v6  ;;  %v3095_v25 = vor.u32 %v3651_v19, %v3092_v20  ;;  %v3196_v26 = vld [vmem:[#allocation7 + $0x2b8] sm:$0xf0] }
  0xfb   :  { %v3750_v6 = vld [vmem:[#allocation7 + $0x4cc] sm:$0xf]  ;;  %v3484_v29 = vld [vmem:[#allocation7 + $0x4f0] sm:$0xf0] }
  0xfc   :  { %1970 = vmatmul.bf16.vlgmr.msrb.gmra.mxu1 %v3986_v23  ;;  %1996 = vmatmul.bf16.vlgmr.msra.gmra.mxu0 %v3986_v23  ;;  %v3710_v19 = vld [vmem:[#allocation7 + $0x38c] sm:$0xf]  ;;  %v3324_v20 = vld [vmem:[#allocation7 + $0x3b0] sm:$0xf0] }
  0xfd   :  { %2014 = vmatpush.bf16.msra.mxu1 %v3163_v31  ;;  %2040 = vmatpush.bf16.msrb.mxu0 %v3167_v32  ;;  %v3719_v31 = vld [vmem:[#allocation7 + $0x3d4] sm:$0xf]  ;;  %v3356_v32 = vld [vmem:[#allocation7 + $0x3f8] sm:$0xf0] }
  0xfe   :  { %v864_v45 = vpop.f32.mrf.mxu3  ;;  %v888_v50 = vpop.f32.mrf.mxu0  ;;  %v3359_v39 = vor.u32 %v3719_v31, %v3356_v32  ;;  %v3641_v31 = vld [vmem:[#allocation7 + $0x164] sm:$0xf]  ;;  %v3052_v32 = vld [vmem:[#allocation7 + $0x188] sm:$0xf0] }
  0xff   :  { %v889_v51 = vadd.f32 %v888_v50, %v876_v44  ;;  %v2923_v44 = vor.u32 %v3615_v34, %v2922_v33  ;;  %v2927_v45 = vor.u32 %v3610_v36, %v2924_v37  ;;  %v3600_v50 = vld [vmem:[#allocation7 + $0x1c] sm:$0xf]  ;;  %v3195_v33 = vor.u32 %v3684_v35, %v3194_v56  ;;  %v3601_v56 = vld [vmem:[#allocation7 + $0x24] sm:$0xf]  ;;  %v2892_v35 = vld [vmem:[#allocation7 + $0x48] sm:$0xf0] }
 0x100   :  { %v3199_v34 = vor.u32 %v3679_v24, %v3196_v26  ;;  %v3487_v37 = vor.u32 %v3750_v6, %v3484_v29  ;;  %v2895_v26 = vor.u32 %v3601_v56, %v2892_v35  ;;  %v3700_v6 = vld [vmem:[#allocation7 + $0x33c] sm:$0xf]  ;;  %v3284_v29 = vld [vmem:[#allocation7 + $0x360] sm:$0xf0] }
 0x101   :  { %v877_v47 = vpop.f32.mrf.mxu2  ;;  %2015 = vmatpush.bf16.msra.mxu1 %v3123_v40  ;;  %2041 = vmatpush.bf16.msrb.mxu0 %v3127_v41  ;;  %v893_v58 = vmul.f32 0.2, %v889_v51  ;;  %v3314_v40 = vld [vmem:[#allocation7 + $0x380] sm:$0xf]  ;;  %v3714_v41 = vld [vmem:[#allocation7 + $0x3a4] sm:$0xf0] }
 0x102   :  { %v3170_v47 = vld [vmem:[#allocation7 + $0x250] sm:$0xf]  ;;  %v3315_v54 = vor.u32 %v3714_v41, %v3314_v40  ;;  %v3055_v41 = vor.u32 %v3641_v31, %v3052_v32  ;;  %v3242_v31 = vld [vmem:[#allocation7 + $0x2e8] sm:$0xf]  ;;  %v3252_v56 = vld [vmem:[#allocation7 + $0x318] sm:$0xf0] }
 0x103   :  { %v895_v2 = vmax.f32 %v889_v51, %v893_v58  ;;  %v2884_v51 = vld [vmem:[#allocation7 + $0x40] sm:$0xf0]  ;;  %v2883_v58 = vor.u32 %v3605_v49, %v2882_v48  ;;  %v3631_v48 = vld [vmem:[#allocation7 + $0x114] sm:$0xf]  ;;  %v3012_v49 = vld [vmem:[#allocation7 + $0x138] sm:$0xf0] }
 0x104   :  { %v2887_v59 = vor.u32 %v3600_v50, %v2884_v51  ;;  %v3695_v32 = vld [vmem:[#allocation7 + $0x30c] sm:$0xf0] }
 0x105   :  { %2016 = vmatpush.bf16.msra.mxu1 %v3083_v52  ;;  %2042 = vmatpush.bf16.msrb.mxu0 %v3087_v53  ;;  %v3996_v9 = vpack.c.bf16 %v895_v2, %v895_v2  ;;  %v3676_v52 = vld [vmem:[#allocation7 + $0x274] sm:$0xf0]  ;;  %v3671_v53 = vld [vmem:[#allocation7 + $0x254] sm:$0xf] }
 0x106   :  { %v890_v14 = vpop.f32.mrf.mxu0  ;;  %v3171_v63 = vor.u32 %v3676_v52, %v3170_v47  ;;  %v3175_v0 = vor.u32 %v3671_v53, %v3172_v55  ;;  %v3699_v2 = vld [vmem:[#allocation7 + $0x334] sm:$0xf]  ;;  %v3402_v47 = vld [vmem:[#allocation7 + $0x428] sm:$0xf]  ;;  %v3735_v52 = vld [vmem:[#allocation7 + $0x44c] sm:$0xf0]  ;;  %v3015_v55 = vor.u32 %v3631_v48, %v3012_v49 }
 0x107   :  { %1879 = vmatmul.bf16.vlgmr.msrb.gmra.mxu3 %v3996_v9  ;;  %1905 = vmatmul.bf16.vlgmr.msra.gmra.mxu2 %v3996_v9 }
 0x108   :  { %1975 = vmatpush.bf16.msrb.mxu3 %v3475_v3  ;;  %2001 = vmatpush.bf16.msra.mxu2 %v3479_v4  ;;  %v3276_v3 = vld [vmem:[#allocation7 + $0x358] sm:$0xf0]  ;;  %v3130_v4 = vld [vmem:[#allocation7 + $0x200] sm:$0xf] }
 0x109   :  { %2017 = vmatpush.bf16.msra.mxu1 %v3043_v10  ;;  %2043 = vmatpush.bf16.msrb.mxu0 %v3047_v1  ;;  %v3132_v10 = vld [vmem:[#allocation7 + $0x228] sm:$0xf0]  ;;  %v3275_v1 = vor.u32 %v3704_v62, %v3274_v60  ;;  %v3279_v11 = vor.u32 %v3699_v2, %v3276_v3  ;;  %v3131_v14 = vor.u32 %v3666_v5, %v3130_v4  ;;  %v3621_v60 = vld [vmem:[#allocation7 + $0xc4] sm:$0xf]  ;;  %v3362_v2 = vld [vmem:[#allocation7 + $0x3d8] sm:$0xf] }
 0x10a   :  { %v3135_v15 = vor.u32 %v3661_v8, %v3132_v10  ;;  %v2972_v62 = vld [vmem:[#allocation7 + $0xe8] sm:$0xf0]  ;;  %v3725_v3 = vld [vmem:[#allocation7 + $0x3fc] sm:$0xf0]  ;;  %v3720_v8 = vld [vmem:[#allocation7 + $0x3dc] sm:$0xf] }
 0x10b   :  { %v2975_v5 = vor.u32 %v3621_v60, %v2972_v62  ;;  %v3364_v10 = vld [vmem:[#allocation7 + $0x400] sm:$0xf0]  ;;  %v3412_v60 = vld [vmem:[#allocation7 + $0x458] sm:$0xf0] }
 0x10c   :  { %1976 = vmatpush.bf16.msrb.mxu3 %v3435_v17  ;;  %2002 = vmatpush.bf16.msra.mxu2 %v3439_v18  ;;  %v3090_v17 = vld [vmem:[#allocation7 + $0x1b0] sm:$0xf]  ;;  %v3656_v18 = vld [vmem:[#allocation7 + $0x1d4] sm:$0xf0] }
 0x10d   :  { %2018 = vmatpush.bf16.msra.mxu1 %v3003_v21  ;;  %2044 = vmatpush.bf16.msrb.mxu0 %v3007_v22  ;;  %v3235_v21 = vor.u32 %v3694_v13, %v3234_v12  ;;  %v3239_v22 = vor.u32 %v3689_v7, %v3236_v61  ;;  %v3091_v16 = vor.u32 %v3656_v18, %v3090_v17  ;;  %v3611_v12 = vld [vmem:[#allocation7 + $0x74] sm:$0xf]  ;;  %v2932_v13 = vld [vmem:[#allocation7 + $0x98] sm:$0xf0]  ;;  %v3322_v7 = vld [vmem:[#allocation7 + $0x388] sm:$0xf] }
 0x10e   :  { %v3715_v61 = vld [vmem:[#allocation7 + $0x3ac] sm:$0xf0]  ;;  %v2935_v18 = vor.u32 %v3611_v12, %v2932_v13  ;;  %v3332_v12 = vld [vmem:[#allocation7 + $0x3b8] sm:$0xf0] }
 0x10f   :  { %v3323_v24 = vor.u32 %v3715_v61, %v3322_v7  ;;  %v3706_v7 = vld [vmem:[#allocation7 + $0x364] sm:$0xf0]  ;;  %v3701_v61 = vld [vmem:[#allocation7 + $0x344] sm:$0xf] }
 0x110   :  { %1977 = vmatpush.bf16.msrb.mxu3 %v3395_v27  ;;  %2003 = vmatpush.bf16.msra.mxu2 %v3399_v28  ;;  %v3482_v27 = vld [vmem:[#allocation7 + $0x4c8] sm:$0xf]  ;;  %v3755_v28 = vld [vmem:[#allocation7 + $0x4ec] sm:$0xf0] }
 0x111   :  { %2019 = vmatpush.bf16.msra.mxu1 %v2963_v30  ;;  %2045 = vmatpush.bf16.msrb.mxu0 %v2967_v42  ;;  %v3050_v30 = vld [vmem:[#allocation7 + $0x160] sm:$0xf]  ;;  %v3646_v42 = vld [vmem:[#allocation7 + $0x184] sm:$0xf0]  ;;  %v3483_v36 = vor.u32 %v3755_v28, %v3482_v27  ;;  %v3282_v27 = vld [vmem:[#allocation7 + $0x338] sm:$0xf] }
 0x112   :  { %v3051_v40 = vor.u32 %v3646_v42, %v3050_v30  ;;  %v3705_v28 = vld [vmem:[#allocation7 + $0x35c] sm:$0xf0]  ;;  %v3287_v42 = vor.u32 %v3700_v6, %v3284_v29 }
 0x113   :  { %v3283_v30 = vor.u32 %v3705_v28, %v3282_v27  ;;  %v3212_v27 = vld [vmem:[#allocation7 + $0x2c8] sm:$0xf0] }
 0x114   :  { %1978 = vmatpush.bf16.msrb.mxu3 %v3355_v38  ;;  %2004 = vmatpush.bf16.msra.mxu2 %v3359_v39  ;;  %v3442_v38 = vld [vmem:[#allocation7 + $0x478] sm:$0xf]  ;;  %v3745_v39 = vld [vmem:[#allocation7 + $0x49c] sm:$0xf0] }
 0x115   :  { %2020 = vmatpush.bf16.msra.mxu1 %v2923_v44  ;;  %2046 = vmatpush.bf16.msrb.mxu0 %v2927_v45  ;;  %v3444_v44 = vld [vmem:[#allocation7 + $0x4a0] sm:$0xf0]  ;;  %v3010_v45 = vld [vmem:[#allocation7 + $0x110] sm:$0xf]  ;;  %v3443_v50 = vor.u32 %v3745_v39, %v3442_v38  ;;  %v3202_v38 = vld [vmem:[#allocation7 + $0x298] sm:$0xf] }
 0x116   :  { %v3447_v51 = vor.u32 %v3740_v43, %v3444_v44  ;;  %v3011_v53 = vor.u32 %v3636_v46, %v3010_v45  ;;  %v3685_v39 = vld [vmem:[#allocation7 + $0x2bc] sm:$0xf0]  ;;  %v3490_v43 = vld [vmem:[#allocation7 + $0x4d0] sm:$0xf]  ;;  %v3756_v44 = vld [vmem:[#allocation7 + $0x4f4] sm:$0xf0] }
 0x117   :  { %1931 = vmatmul.bf16.vlgmr.msra.gmra.mxu3 %v3996_v9  ;;  %1957 = vmatmul.bf16.vlgmr.msrb.gmra.mxu2 %v3996_v9  ;;  %v3751_v45 = vld [vmem:[#allocation7 + $0x4d4] sm:$0xf]  ;;  %v3492_v46 = vld [vmem:[#allocation7 + $0x4f8] sm:$0xf0]  ;;  %v3203_v48 = vor.u32 %v3685_v39, %v3202_v38 }
 0x118   :  { %1979 = vmatpush.bf16.msrb.mxu3 %v3315_v54  ;;  %2005 = vmatpush.bf16.msra.mxu2 %v3319_v57  ;;  %v3730_v54 = vld [vmem:[#allocation7 + $0x42c] sm:$0xf]  ;;  %v3404_v57 = vld [vmem:[#allocation7 + $0x450] sm:$0xf0] }
 0x119   :  { %2021 = vmatpush.bf16.msra.mxu1 %v2883_v58  ;;  %2047 = vmatpush.bf16.msrb.mxu0 %v2887_v59  ;;  %v2970_v58 = vld [vmem:[#allocation7 + $0xc0] sm:$0xf]  ;;  %v3626_v59 = vld [vmem:[#allocation7 + $0xe4] sm:$0xf0] }
 0x11a   :  { %v2971_v4 = vor.u32 %v3626_v59, %v2970_v58  ;;  %v3736_v58 = vld [vmem:[#allocation7 + $0x454] sm:$0xf0]  ;;  %v3731_v59 = vld [vmem:[#allocation7 + $0x434] sm:$0xf] }
 0x11c   :  { %2022 = vmatmul.bf16.vlgmr.msra.gmra.mxu1 %v3986_v23  ;;  %2048 = vmatmul.bf16.vlgmr.msrb.gmra.mxu0 %v3986_v23 }
 0x11d   :  { %2066 = vmatpush.bf16.msrb.mxu1 %v3171_v63  ;;  %2092 = vmatpush.bf16.msra.mxu0 %v3175_v0  ;;  %v3403_v63 = vor.u32 %v3735_v52, %v3402_v47  ;;  %v3407_v0 = vor.u32 %v3730_v54, %v3404_v57  ;;  %v3450_v47 = vld [vmem:[#allocation7 + $0x480] sm:$0xf]  ;;  %v3741_v52 = vld [vmem:[#allocation7 + $0x484] sm:$0xf]  ;;  %v3410_v57 = vld [vmem:[#allocation7 + $0x430] sm:$0xf] }
 0x11e   :  { %1980 = vmatpush.bf16.msrb.mxu3 %v3275_v1  ;;  %2006 = vmatpush.bf16.msra.mxu2 %v3279_v11  ;;  %v2930_v1 = vld [vmem:[#allocation7 + $0x70] sm:$0xf]  ;;  %v3616_v11 = vld [vmem:[#allocation7 + $0x94] sm:$0xf0]  ;;  %v3411_v62 = vor.u32 %v3736_v58, %v3410_v57 }
 0x11f   :  { %v2931_v17 = vor.u32 %v3616_v11, %v2930_v1  ;;  %v3716_v1 = vld [vmem:[#allocation7 + $0x3b4] sm:$0xf0]  ;;  %v3711_v11 = vld [vmem:[#allocation7 + $0x394] sm:$0xf] }
 0x121   :  { %2067 = vmatpush.bf16.msrb.mxu1 %v3131_v14  ;;  %2093 = vmatpush.bf16.msra.mxu0 %v3135_v15  ;;  %v3363_v14 = vor.u32 %v3725_v3, %v3362_v2  ;;  %v3367_v15 = vor.u32 %v3720_v8, %v3364_v10  ;;  %v3726_v2 = vld [vmem:[#allocation7 + $0x404] sm:$0xf0]  ;;  %v3721_v3 = vld [vmem:[#allocation7 + $0x3e4] sm:$0xf]  ;;  %v3330_v10 = vld [vmem:[#allocation7 + $0x390] sm:$0xf] }
 0x122   :  { %1981 = vmatpush.bf16.msrb.mxu3 %v3235_v21  ;;  %2007 = vmatpush.bf16.msra.mxu2 %v3239_v22  ;;  %v2890_v21 = vld [vmem:[#allocation7 + $0x20] sm:$0xf]  ;;  %v3606_v22 = vld [vmem:[#allocation7 + $0x44] sm:$0xf0]  ;;  %v3331_v13 = vor.u32 %v3716_v1, %v3330_v10 }
 0x125   :  { %2068 = vmatpush.bf16.msrb.mxu1 %v3091_v16  ;;  %2094 = vmatpush.bf16.msra.mxu0 %v3095_v25  ;;  %v3327_v16 = vor.u32 %v3710_v19, %v3324_v20  ;;  %v2891_v25 = vor.u32 %v3606_v22, %v2890_v21  ;;  %v3250_v20 = vld [vmem:[#allocation7 + $0x2f0] sm:$0xf]  ;;  %v3696_v21 = vld [vmem:[#allocation7 + $0x314] sm:$0xf0]  ;;  %v3691_v22 = vld [vmem:[#allocation7 + $0x2f4] sm:$0xf] }
 0x126   :  { %1982 = vmatpush.bf16.msrb.mxu3 %v3195_v33  ;;  %2008 = vmatpush.bf16.msra.mxu2 %v3199_v34  ;;  %v3690_v33 = vld [vmem:[#allocation7 + $0x2ec] sm:$0xf]  ;;  %v3244_v34 = vld [vmem:[#allocation7 + $0x310] sm:$0xf0]  ;;  %v3251_v35 = vor.u32 %v3696_v21, %v3250_v20 }
 0x129   :  { %2069 = vmatpush.bf16.msrb.mxu1 %v3051_v40  ;;  %2095 = vmatpush.bf16.msra.mxu0 %v3055_v41  ;;  %v3680_v40 = vld [vmem:[#allocation7 + $0x29c] sm:$0xf]  ;;  %v3204_v41 = vld [vmem:[#allocation7 + $0x2c0] sm:$0xf0] }
 0x12a   :  { %2027 = vmatpush.bf16.msra.mxu3 %v3483_v36  ;;  %2053 = vmatpush.bf16.msrb.mxu2 %v3487_v37  ;;  %v3243_v36 = vor.u32 %v3695_v32, %v3242_v31  ;;  %v3247_v37 = vor.u32 %v3690_v33, %v3244_v34  ;;  %v3207_v49 = vor.u32 %v3680_v40, %v3204_v41 }
 0x12b   :  { %1983 = vmatmul.bf16.vlgmr.msrb.gmra.mxu3 %v3996_v9  ;;  %2009 = vmatmul.bf16.vlgmr.msra.gmra.mxu2 %v3996_v9 }
 0x12d   :  { %2070 = vmatpush.bf16.msrb.mxu1 %v3011_v53  ;;  %2096 = vmatpush.bf16.msra.mxu0 %v3015_v55  ;;  %v3452_v53 = vld [vmem:[#allocation7 + $0x4a8] sm:$0xf0] }
 0x12e   :  { %2028 = vmatpush.bf16.msra.mxu3 %v3443_v50  ;;  %2054 = vmatpush.bf16.msrb.mxu2 %v3447_v51  ;;  %v3491_v50 = vor.u32 %v3756_v44, %v3490_v43  ;;  %v3495_v51 = vor.u32 %v3751_v45, %v3492_v46  ;;  %v3455_v54 = vor.u32 %v3741_v52, %v3452_v53 }
 0x131   :  { %2071 = vmatpush.bf16.msrb.mxu1 %v2971_v4  ;;  %2097 = vmatpush.bf16.msra.mxu0 %v2975_v5  ;;  %v3372_v4 = vld [vmem:[#allocation7 + $0x408] sm:$0xf0] }
 0x132   :  { %2029 = vmatpush.bf16.msra.mxu3 %v3403_v63  ;;  %2055 = vmatpush.bf16.msrb.mxu2 %v3407_v0  ;;  %v3415_v63 = vor.u32 %v3731_v59, %v3412_v60  ;;  %v3370_v0 = vld [vmem:[#allocation7 + $0x3e0] sm:$0xf]  ;;  %v3375_v8 = vor.u32 %v3721_v3, %v3372_v4 }
 0x133   :  { %v3371_v5 = vor.u32 %v3726_v2, %v3370_v0 }
 0x135   :  { %2072 = vmatpush.bf16.msrb.mxu1 %v2931_v17  ;;  %2098 = vmatpush.bf16.msra.mxu0 %v2935_v18  ;;  %v3292_v17 = vld [vmem:[#allocation7 + $0x368] sm:$0xf0] }
 0x136   :  { %2030 = vmatpush.bf16.msra.mxu3 %v3363_v14  ;;  %2056 = vmatpush.bf16.msrb.mxu2 %v3367_v15  ;;  %v3335_v14 = vor.u32 %v3711_v11, %v3332_v12  ;;  %v3290_v15 = vld [vmem:[#allocation7 + $0x340] sm:$0xf]  ;;  %v3295_v19 = vor.u32 %v3701_v61, %v3292_v17 }
 0x137   :  { %v3291_v18 = vor.u32 %v3706_v7, %v3290_v15 }
 0x139   :  { %2073 = vmatpush.bf16.msrb.mxu1 %v2891_v25  ;;  %2099 = vmatpush.bf16.msra.mxu0 %v2895_v26  ;;  %v3686_v25 = vld [vmem:[#allocation7 + $0x2c4] sm:$0xf0]  ;;  %v3681_v26 = vld [vmem:[#allocation7 + $0x2a4] sm:$0xf] }
 0x13a   :  { %2031 = vmatpush.bf16.msra.mxu3 %v3323_v24  ;;  %2057 = vmatpush.bf16.msrb.mxu2 %v3327_v16  ;;  %v3255_v24 = vor.u32 %v3691_v22, %v3252_v56  ;;  %v3210_v16 = vld [vmem:[#allocation7 + $0x2a0] sm:$0xf] }
 0x13b   :  { %v3211_v29 = vor.u32 %v3686_v25, %v3210_v16 }
 0x13c   :  { %2074 = vmatmul.bf16.vlgmr.msrb.gmra.mxu1 %v3986_v23  ;;  %2100 = vmatmul.bf16.vlgmr.msra.gmra.mxu0 %v3986_v23  ;;  %v3746_v23 = vld [vmem:[#allocation7 + $0x4a4] sm:$0xf0] }
 0x13d   :  { %v3451_v55 = vor.u32 %v3746_v23, %v3450_v47 }
 0x13e   :  { %2032 = vmatpush.bf16.msra.mxu3 %v3283_v30  ;;  %2058 = vmatpush.bf16.msrb.mxu2 %v3287_v42  ;;  %v3215_v30 = vor.u32 %v3681_v26, %v3212_v27 }
 0x142   :  { %2033 = vmatpush.bf16.msra.mxu3 %v3243_v36  ;;  %2059 = vmatpush.bf16.msrb.mxu2 %v3247_v37 }
 0x146   :  { %2034 = vmatpush.bf16.msra.mxu3 %v3203_v48  ;;  %2060 = vmatpush.bf16.msrb.mxu2 %v3207_v49 }
 0x149   :  { %2035 = vmatmul.bf16.vlgmr.msra.gmra.mxu3 %v3996_v9  ;;  %2061 = vmatmul.bf16.vlgmr.msrb.gmra.mxu2 %v3996_v9 }
 0x14a   :  { %2079 = vmatpush.bf16.msrb.mxu3 %v3491_v50  ;;  %2105 = vmatpush.bf16.msra.mxu2 %v3495_v51 }
 0x14e   :  { %2080 = vmatpush.bf16.msrb.mxu3 %v3451_v55  ;;  %2106 = vmatpush.bf16.msra.mxu2 %v3455_v54 }
 0x152   :  { %2081 = vmatpush.bf16.msrb.mxu3 %v3411_v62  ;;  %2107 = vmatpush.bf16.msra.mxu2 %v3415_v63 }
 0x156   :  { %2082 = vmatpush.bf16.msrb.mxu3 %v3371_v5  ;;  %2108 = vmatpush.bf16.msra.mxu2 %v3375_v8 }
 0x159   :  { %v1867_v28 = vpop.f32.mrf.mxu1  ;;  %v1893_v6 = vpop.f32.mrf.mxu0 }
 0x15a   :  { %2083 = vmatpush.bf16.msrb.mxu3 %v3331_v13  ;;  %2109 = vmatpush.bf16.msra.mxu2 %v3335_v14 }
 0x15e   :  { %2084 = vmatpush.bf16.msrb.mxu3 %v3291_v18  ;;  %2110 = vmatpush.bf16.msra.mxu2 %v3295_v19 }
 0x161   :  { %v1869_v42 = vpop.f32.mrf.mxu1  ;;  %v1895_v31 = vpop.f32.mrf.mxu0 }
 0x162   :  { %2085 = vmatpush.bf16.msrb.mxu3 %v3251_v35  ;;  %2111 = vmatpush.bf16.msra.mxu2 %v3255_v24 }
 0x166   :  { %2086 = vmatpush.bf16.msrb.mxu3 %v3211_v29  ;;  %2112 = vmatpush.bf16.msra.mxu2 %v3215_v30 }
 0x169   :  { %2087 = vmatmul.bf16.vlgmr.msrb.gmra.mxu3 %v3996_v9  ;;  %2113 = vmatmul.bf16.vlgmr.msra.gmra.mxu2 %v3996_v9  ;;  %v1919_v32 = vpop.f32.mrf.mxu1  ;;  %v1945_v33 = vpop.f32.mrf.mxu0 }
 0x171   :  { %v1921_v34 = vpop.f32.mrf.mxu1  ;;  %v1947_v36 = vpop.f32.mrf.mxu0 }
 0x179   :  { %v1971_v37 = vpop.f32.mrf.mxu1  ;;  %v1997_v38 = vpop.f32.mrf.mxu0 }
 0x181   :  { %v1973_v39 = vpop.f32.mrf.mxu1  ;;  %v1999_v40 = vpop.f32.mrf.mxu0 }
 0x18a   :  { %v1880_v41 = vpop.f32.mrf.mxu3  ;;  %v1906_v43 = vpop.f32.mrf.mxu2 }
 0x18b   :  { %v1881_v44 = vadd.f32 %v1880_v41, %v1867_v28  ;;  %v1907_v45 = vadd.f32 %v1906_v43, %v1893_v6 }
 0x18d   :  { %v2120_v46 = vrot.slane %v1881_v44, 4  ;;  %v2126_v48 = vrot.slane %v1907_v45, 4 }
 0x18f   :  { %v2121_v49 = vmax.f32 %v1881_v44, %v2120_v46  ;;  %v2127_v50 = vmax.f32 %v1907_v45, %v2126_v48 }
 0x191   :  { %v2122_v51 = vrot.slane %v2121_v49, 2  ;;  %v2128_v9 = vrot.slane %v2127_v50, 2 }
 0x192   :  { %v1882_v47 = vpop.f32.mrf.mxu3  ;;  %v1908_v23 = vpop.f32.mrf.mxu2 }
 0x193   :  { %v2123_v52 = vmax.f32 %v2121_v49, %v2122_v51  ;;  %v2129_v53 = vmax.f32 %v2127_v50, %v2128_v9  ;;  %v2258_v50 = vld [vmem:[%s4189_s5 + $0x78] sm:$0xff] }
 0x194   :  { %v2274_v51 = vld [vmem:[%s4189_s5 + $0xf8] sm:$0xff]  ;;  %2281 = vmatpush.msra.mxu1 %v2258_v50  ;;  %v2327_v50 = vld [vmem:[%s4191_s7 + $0x30] sm:$0xff] }
 0x195   :  { %v2124_v55 = vrot.slane %v2123_v52, 1  ;;  %v2130_v54 = vrot.slane %v2129_v53, 1  ;;  %2301 = vmatpush.msra.mxu3 %v2274_v51  ;;  %v2325_v51 = vld [vmem:[%s4191_s7 + $0x20] sm:$0xff]  ;;  %2351 = vmatpush.msrb.mxu0 %v2327_v50 }
 0x197   :  { %v2131_v57 = vmax.f32 %v2129_v53, %v2130_v54  ;;  %v2125_v58 = vmax.f32 %v2123_v52, %v2124_v55  ;;  %v2257_v53 = vld [vmem:[%s4189_s5 + $0x70] sm:$0xff]  ;;  %2352 = vmatpush.msrb.mxu0 %v2325_v51  ;;  %v2399_v51 = vld [vmem:[#allocation3] sm:$0x1] }
 0x198   :  { %v2273_v55 = vld [vmem:[%s4189_s5 + $0xf0] sm:$0xff]  ;;  %2282 = vmatpush.msra.mxu1 %v2257_v53 }
 0x199   :  { %v2190_v59 = vrot.slane %v2131_v57, 7  ;;  %v2023_v60 = vpop.f32.mrf.mxu1  ;;  %v2049_v62 = vpop.f32.mrf.mxu0  ;;  %2302 = vmatpush.msra.mxu3 %v2273_v55 }
 0x19a   :  { %v1932_v63 = vpop.f32.mrf.mxu3  ;;  %v1958_v0 = vpop.f32.mrf.mxu2 }
 0x19b   :  { %v2199_v2 = vsel %vm2198_vm1, %v2125_v58, %v2190_v59  ;;  %v1933_v3 = vadd.f32 %v1932_v63, %v1919_v32  ;;  %v1959_v4 = vadd.f32 %v1958_v0, %v1945_v33  ;;  %v2256_v58 = vld [vmem:[%s4189_s5 + $0x68] sm:$0xff]  ;;  %v2255_v0 = vld [vmem:[%s4189_s5 + $0x60] sm:$0xff] }
 0x19c   :  { %v2272_v59 = vld [vmem:[%s4189_s5 + $0xe8] sm:$0xff]  ;;  %2283 = vmatpush.msra.mxu1 %v2256_v58  ;;  %v2228_v58 = vld [vmem:[%s4188_s4] sm:$0xff] }
 0x19d   :  { %v2132_v5 = vrot.slane %v1933_v3, 4  ;;  %v2138_v8 = vrot.slane %v1959_v4, 4  ;;  %2303 = vmatpush.msra.mxu3 %v2272_v59 }
 0x19e   :  { %2284 = vmatpush.msra.mxu1 %v2255_v0 }
 0x19f   :  { %v2133_v10 = vmax.f32 %v1933_v3, %v2132_v5  ;;  %v2139_v1 = vmax.f32 %v1959_v4, %v2138_v8  ;;  %v3856_v8 = vmov -inf   ;;  %v2323_v3 = vld [vmem:[%s4191_s7 + $0x10] sm:$0xff] }
 0x1a0   :  { %2353 = vmatpush.msrb.mxu0 %v2323_v3 }
 0x1a1   :  { %v2134_v11 = vrot.slane %v2133_v10, 2  ;;  %v2140_v12 = vrot.slane %v2139_v1, 2  ;;  %v2025_v13 = vpop.f32.mrf.mxu1  ;;  %v2051_v14 = vpop.f32.mrf.mxu0 }
 0x1a2   :  { %v1934_v15 = vpop.f32.mrf.mxu3  ;;  %v1960_v7 = vpop.f32.mrf.mxu2 }
 0x1a3   :  { %v2135_v61 = vmax.f32 %v2133_v10, %v2134_v11  ;;  %v2141_v17 = vmax.f32 %v2139_v1, %v2140_v12  ;;  %v2254_v10 = vld [vmem:[%s4189_s5 + $0x58] sm:$0xff]  ;;  %v2253_v15 = vld [vmem:[%s4189_s5 + $0x50] sm:$0xff] }
 0x1a4   :  { %v2270_v1 = vld [vmem:[%s4189_s5 + $0xd8] sm:$0xff]  ;;  %2285 = vmatpush.msra.mxu1 %v2254_v10  ;;  %v2269_v7 = vld [vmem:[%s4189_s5 + $0xd0] sm:$0xff] }
 0x1a5   :  { %v2136_v18 = vrot.slane %v2135_v61, 1  ;;  %v2142_v19 = vrot.slane %v2141_v17, 1 }
 0x1a6   :  { %2286 = vmatpush.msra.mxu1 %v2253_v15 }
 0x1a7   :  { %v2137_v20 = vmax.f32 %v2135_v61, %v2136_v18  ;;  %v2143_v21 = vmax.f32 %v2141_v17, %v2142_v19  ;;  %v2252_v18 = vld [vmem:[%s4189_s5 + $0x48] sm:$0xff] }
 0x1a8   :  { %v2268_v19 = vld [vmem:[%s4189_s5 + $0xc8] sm:$0xff]  ;;  %2287 = vmatpush.msra.mxu1 %v2252_v18 }
 0x1a9   :  { %v2191_v22 = vrot.slane %v2137_v20, 6  ;;  %v2192_v56 = vrot.slane %v2143_v21, 5 }
 0x1ab   :  { %v2201_v35 = vsel %vm2200_vm2, %v2191_v22, %v2192_v56  ;;  %v2251_v22 = vld [vmem:[%s4189_s5 + $0x40] sm:$0xff] }
 0x1ac   :  { %v4013_v25 = vsel %vm2202_vm3, %v2199_v2, %v2201_v35  ;;  %v2271_v2 = vld [vmem:[%s4189_s5 + $0xe0] sm:$0xff]  ;;  %2288 = vmatpush.msra.mxu1 %v2251_v22 }
 0x1ad   :  { %2304 = vmatpush.msra.mxu3 %v2271_v2  ;;  %v2267_v56 = vld [vmem:[%s4189_s5 + $0xc0] sm:$0xff] }
 0x1ae   :  { %v1984_v24 = vpop.f32.mrf.mxu3  ;;  %v2010_v16 = vpop.f32.mrf.mxu2  ;;  %v2321_v22 = vld [vmem:[%s4191_s7] sm:$0xff] }
 0x1af   :  { %v1985_v26 = vadd.f32 %v1984_v24, %v1971_v37  ;;  %v2011_v27 = vadd.f32 %v2010_v16, %v1997_v38  ;;  %2305 = vmatpush.msra.mxu3 %v2270_v1  ;;  %v2250_v16 = vld [vmem:[%s4189_s5 + $0x38] sm:$0xff]  ;;  %2354 = vmatpush.msrb.mxu0 %v2321_v22 }
 0x1b0   :  { %2289 = vmatpush.msra.mxu1 %v2250_v16 }
 0x1b1   :  { %v2144_v28 = vrot.slane %v1985_v26, 4  ;;  %v2150_v6 = vrot.slane %v2011_v27, 4  ;;  %2306 = vmatpush.msra.mxu3 %v2269_v7 }
 0x1b3   :  { %v2145_v29 = vmax.f32 %v1985_v26, %v2144_v28  ;;  %v2151_v30 = vmax.f32 %v2011_v27, %v2150_v6  ;;  %2307 = vmatpush.msra.mxu3 %v2268_v19  ;;  %v2266_v26 = vld [vmem:[%s4189_s5 + $0xb8] sm:$0xff]  ;;  %v2249_v28 = vld [vmem:[%s4189_s5 + $0x30] sm:$0xff] }
 0x1b4   :  { %v2265_v6 = vld [vmem:[%s4189_s5 + $0xb0] sm:$0xff]  ;;  %2290 = vmatpush.msra.mxu1 %v2249_v28 }
 0x1b5   :  { %v2146_v42 = vrot.slane %v2145_v29, 2  ;;  %v2152_v31 = vrot.slane %v2151_v30, 2  ;;  %2308 = vmatpush.msra.mxu3 %v2267_v56  ;;  %v2324_v56 = vld [vmem:[%s4191_s7 + $0x18] sm:$0xff] }
 0x1b6   :  { %v1986_v32 = vpop.f32.mrf.mxu3  ;;  %v2012_v33 = vpop.f32.mrf.mxu2 }
 0x1b7   :  { %v2147_v34 = vmax.f32 %v2145_v29, %v2146_v42  ;;  %v2153_v36 = vmax.f32 %v2151_v30, %v2152_v31  ;;  %2309 = vmatpush.msra.mxu3 %v2266_v26  ;;  %v2248_v29 = vld [vmem:[%s4189_s5 + $0x28] sm:$0xff]  ;;  %v2247_v32 = vld [vmem:[%s4189_s5 + $0x20] sm:$0xff] }
 0x1b8   :  { %v2264_v42 = vld [vmem:[%s4189_s5 + $0xa8] sm:$0xff]  ;;  %v2263_v33 = vld [vmem:[%s4189_s5 + $0xa0] sm:$0xff]  ;;  %2291 = vmatpush.msra.mxu1 %v2248_v29 }
 0x1b9   :  { %v2148_v39 = vrot.slane %v2147_v34, 1  ;;  %v2154_v40 = vrot.slane %v2153_v36, 1  ;;  %v4015_v41 = vpop.f32.mrf.mxu1  ;;  %v4017_v43 = vpop.f32.mrf.mxu0  ;;  %2310 = vmatpush.msra.mxu3 %v2265_v6  ;;  %v2329_v6 = vld [vmem:[%s4192_s8] sm:$0x3] }
 0x1ba   :  { %2292 = vmatpush.msra.mxu1 %v2247_v32  ;;  %v2331_v29 = vperm.slane %v2329_v6, 0  ;;  %v2397_v32 = vld [vmem:[%s4193_s9 + $0x10] sm:$0xff] }
 0x1bb   :  { %v2149_v44 = vmax.f32 %v2147_v34, %v2148_v39  ;;  %v2155_v45 = vmax.f32 %v2153_v36, %v2154_v40  ;;  %2311 = vmatpush.msra.mxu3 %v2264_v42  ;;  %v2246_v34 = vld [vmem:[%s4189_s5 + $0x18] sm:$0xff]  ;;  %v2261_v39 = vld [vmem:[%s4189_s5 + $0x90] sm:$0xff]  ;;  %v2244_v40 = vld [vmem:[%s4189_s5 + $0x8] sm:$0xff] }
 0x1bc   :  { %v2262_v36 = vld [vmem:[%s4189_s5 + $0x98] sm:$0xff]  ;;  %2293 = vmatpush.msra.mxu1 %v2246_v34  ;;  %v2395_v34 = vld [vmem:[%s4193_s9] sm:$0xff] }
 0x1bd   :  { %v2193_v37 = vrot.slane %v2149_v44, 4  ;;  %v2194_v38 = vrot.slane %v2155_v45, 3  ;;  %2312 = vmatpush.msra.mxu3 %v2263_v33  ;;  %v2260_v44 = vld [vmem:[%s4189_s5 + $0x88] sm:$0xff]  ;;  %v2243_v45 = vld [vmem:[%s4189_s5] sm:$0xff] }
 0x1be   :  { %v2396_v33 = vld [vmem:[%s4193_s9 + $0x8] sm:$0xff] }
 0x1bf   :  { %v4019_v46 = vsel %vm2204_vm4, %v2193_v37, %v2194_v38  ;;  %2313 = vmatpush.msra.mxu3 %v2262_v36  ;;  %v2259_v37 = vld [vmem:[%s4189_s5 + $0x80] sm:$0xff] }
 0x1c1   :  { %v2077_v48 = vpop.f32.mrf.mxu1  ;;  %v2103_v49 = vpop.f32.mrf.mxu0  ;;  %2314 = vmatpush.msra.mxu3 %v2261_v39 }
 0x1c3   :  { %2315 = vmatpush.msra.mxu3 %v2260_v44 }
 0x1c5   :  { %2316 = vmatpush.msra.mxu3 %v2259_v37 }
 0x1cc   :  { %v2036_v9 = vpop.f32.mrf.mxu3  ;;  %v2062_v47 = vpop.f32.mrf.mxu2 }
 0x1cd   :  { %v2037_v23 = vadd.f32 %v2036_v9, %v2023_v60  ;;  %v2063_v52 = vadd.f32 %v2062_v47, %v2049_v62  ;;  %v79_v60 = vlaneseq }
 0x1cf   :  { %v2156_v54 = vrot.slane %v2037_v23, 4  ;;  %v2162_v57 = vrot.slane %v2063_v52, 4  ;;  %vm4045_vm5 = vcmp.lt.s32.totalorder %v79_v60, 256 }
 0x1d0   :  { %83 = vst.msk [vmem:[#allocation2 + $0x8] sm:$0x3] %vm4045_vm5, %v3856_v8 }
 0x1d1   :  { %v2157_v62 = vmax.f32 %v2037_v23, %v2156_v54  ;;  %v2163_v63 = vmax.f32 %v2063_v52, %v2162_v57 }
 0x1d3   :  { %v2158_v4 = vrot.slane %v2157_v62, 2  ;;  %v2164_v5 = vrot.slane %v2163_v63, 2 }
 0x1d4   :  { %v2038_v11 = vpop.f32.mrf.mxu3  ;;  %v2064_v12 = vpop.f32.mrf.mxu2 }
 0x1d5   :  { %v2159_v13 = vmax.f32 %v2157_v62, %v2158_v4  ;;  %v2165_v14 = vmax.f32 %v2163_v63, %v2164_v5 }
 0x1d7   :  { %v2160_v61 = vrot.slane %v2159_v13, 1  ;;  %v2166_v17 = vrot.slane %v2165_v14, 1  ;;  %v2119_v2 = vld [vmem:[#allocation2 + $0x8] sm:$0x3] }
 0x1d9   :  { %v2161_v20 = vmax.f32 %v2159_v13, %v2160_v61  ;;  %v2167_v21 = vmax.f32 %v2165_v14, %v2166_v17  ;;  %v2229_v13 = vld [vmem:[%s4188_s4 + $0x8] sm:$0x3] }
 0x1db   :  { %v2195_v35 = vrot.slane %v2161_v20, 2  ;;  %v2196_v24 = vrot.slane %v2167_v21, 1  ;;  %v2328_v20 = vld [vmem:[%s4191_s7 + $0x38] sm:$0xff]  ;;  %v2326_v21 = vld [vmem:[%s4191_s7 + $0x28] sm:$0xff] }
 0x1dc   :  { %2371 = vmatpush.msrb.mxu2 %v2328_v20 }
 0x1dd   :  { %v2207_v27 = vsel %vm2206_vm6, %v2195_v35, %v2196_v24  ;;  %v2322_v35 = vld [vmem:[%s4191_s7 + $0x8] sm:$0xff]  ;;  %v2275_v24 = vld [vmem:[%s4190_s6] sm:$0x1]  ;;  %s3857_s7 = smov 32   ;;  %s3859_s6 = smov 64  }
 0x1de   :  { %v2209_v30 = vsel %vm2208_vm7, %v4019_v46, %v2207_v27  ;;  %2372 = vmatpush.msrb.mxu2 %v2326_v21 }
 0x1df   :  { %v2211_v31 = vsel %vm2210_vm8, %v4013_v25, %v2209_v30  ;;  %v2245_v25 = vld [vmem:[%s4189_s5 + $0x10] sm:$0xff] }
 0x1e0   :  { %2294 = vmatpush.msra.mxu1 %v2245_v25  ;;  %v2230_v62 = vadd.f32 %v2228_v58, %v2211_v31  ;;  %2373 = vmatpush.msrb.mxu2 %v2324_v56  ;;  %v2398_v31 = vld [vmem:[%s4193_s9 + $0x18] sm:$0xff]  ;;  %v2332_v25 = vperm.slane %v2329_v6, 1  ;;  %s3860_s9 = smov [#allocation9]  }
 0x1e1   :  { %2415 = vmatpush.msra.mxu0 %v2398_v31  ;;  %s2449_s18 = sshll.u32 %s3860_s9, 4  ;;  %s2450_s18 = int_to_ptr.vmem [resolvable:$true] %s2449_s18 }
 0x1e2   :  { %2295 = vmatpush.msra.mxu1 %v2244_v40  ;;  %v2233_v5 = vrot.slane %v2230_v62, 2  ;;  %v2236_v11 = vrot.slane %v2230_v62, 4  ;;  %v2239_v14 = vrot.slane %v2230_v62, 6  ;;  %2374 = vmatpush.msrb.mxu2 %v2322_v35 }
 0x1e3   :  { %2416 = vmatpush.msra.mxu0 %v2397_v32 }
 0x1e4   :  { %2296 = vmatpush.msra.mxu1 %v2243_v45  ;;  %v2235_v1 = vmax.f32 %v2230_v62, %v2233_v5 }
 0x1e5   :  { %2417 = vmatpush.msra.mxu0 %v2396_v33 }
 0x1e6   :  { %v2238_v12 = vmax.f32 %v2235_v1, %v2236_v11 }
 0x1e7   :  { %2418 = vmatpush.msra.mxu0 %v2395_v34 }
 0x1e8   :  { %v2241_v61 = vmax.f32 %v2238_v12, %v2239_v14 }
 0x1ec   :  { %v2088_v38 = vpop.f32.mrf.mxu3  ;;  %v2114_v46 = vpop.f32.mrf.mxu2 }
 0x1ed   :  { %v2089_v48 = vadd.f32 %v2088_v38, %v4015_v41  ;;  %v2115_v49 = vadd.f32 %v2114_v46, %v4017_v43 }
 0x1ef   :  { %v2168_v9 = vrot.slane %v2089_v48, 4  ;;  %v2174_v47 = vrot.slane %v2115_v49, 4 }
 0x1f1   :  { %v2169_v23 = vmax.f32 %v2089_v48, %v2168_v9  ;;  %v2175_v52 = vmax.f32 %v2115_v49, %v2174_v47 }
 0x1f3   :  { %v2170_v53 = vrot.slane %v2169_v23, 2  ;;  %v2176_v41 = vrot.slane %v2175_v52, 2 }
 0x1f4   :  { %v2090_v55 = vpop.f32.mrf.mxu3  ;;  %v2116_v43 = vpop.f32.mrf.mxu2 }
 0x1f5   :  { %v2171_v54 = vmax.f32 %v2169_v23, %v2170_v53  ;;  %v2177_v57 = vmax.f32 %v2175_v52, %v2176_v41 }
 0x1f7   :  { %v2172_v59 = vrot.slane %v2171_v54, 1  ;;  %v2178_v60 = vrot.slane %v2177_v57, 1 }
 0x1f9   :  { %v2179_v63 = vmax.f32 %v2177_v57, %v2178_v60  ;;  %v2173_v0 = vmax.f32 %v2171_v54, %v2172_v59 }
 0x1fb   :  { %v2197_v4 = vrot.slane %v2179_v63, 7 }
 0x1fd   :  { %v2212_v8 = vsel %vm2198_vm1, %v2173_v0, %v2197_v4 }
 0x1fe   :  { %v2216_v10 = vmax.f32 %v2119_v2, %v2212_v8 }
 0x200   :  { %2222 = vst.msk [vmem:[#allocation2 + $0x8] sm:$0x3] %vm4045_vm5, %v2216_v10 }
 0x207   :  { %v2227_v15 = vld [vmem:[#allocation2 + $0x8] sm:$0x3] }
 0x208   :  { %v2231_v7 = vadd.f32 %v2229_v13, %v2227_v15 }
 0x20a   :  { %v2242_v17 = vmax.f32 %v2241_v61, %v2231_v7 }
 0x20c   :  { %v2277_v18 = vperm.slane %v2242_v17, 0  ;;  %v2278_v19 = vperm.slane %v2242_v17, 1 }
 0x20e   :  { %2297 = vmatmul.f32.vlgmr.msra.gmra.mxu1 %v2277_v18  ;;  %2317 = vmatmul.f32.vlgmr.msra.gmra.mxu3 %v2278_v19 }
 0x28b   :  { %v2298_v16 = vpop.f32.mrf.mxu1 }
 0x28c   :  { %v2299_v26 = vadd.f32 %v2298_v16, %v2275_v24 }
 0x291   :  { %v2318_v27 = vpop.f32.mrf.mxu3 }
 0x292   :  { %v2319_v28 = vadd.f32 %v2318_v27, %v2299_v26 }
 0x294   :  { %3496 = vmatmul.msk.f32.vlgmr.msrb.gmra.mxu0 %vm2335_vm9, %v2319_v28  ;;  %3497 = vmatmul.msk.f32.vlgmr.msrb.gmra.mxu2 %vm2335_vm9, %v2319_v28 }
 0x311   :  { %v2356_v30 = vpop.f32.mrf.mxu0 }
 0x312   :  { %v2357_v42 = vadd.f32 %v2356_v30, %v2331_v29 }
 0x314   :  { %2388 = vrot.lane.b32.xlu1 %v2357_v42, %s3857_s7  ;;  %2380 = vrot.lane.b32.xlu0 %v2357_v42, %s3858_s1 }
 0x317   :  { %v2376_v40 = vpop.f32.mrf.mxu2 }
 0x318   :  { %v2377_v38 = vadd.f32 %v2376_v40, %v2332_v25 }
 0x31c   :  { %2384 = vrot.lane.b32.xlu0 %v2357_v42, %s3859_s6 }
 0x386   :  { %v2381_v36 = vpop.permute.xlu0 %2380  ;;  %v2389_v37 = vpop.permute.xlu1 %2388 }
 0x387   :  { %v2383_v39 = vmax.f32 %v2357_v42, %v2381_v36 }
 0x38e   :  { %v2385_v44 = vpop.permute.xlu0 %2384 }
 0x38f   :  { %v2387_v45 = vmax.f32 %v2383_v39, %v2385_v44 }
 0x391   :  { %v2391_v46 = vmax.f32 %v2387_v45, %v2389_v37 }
 0x393   :  { %v2392_v48 = vmax.f32 %v2391_v46, %v2377_v38 }
 0x395   :  { %v2393_v49 = vmul.f32 0.2, %v2392_v48 }
 0x397   :  { %v2394_v50 = vmax.f32 %v2392_v48, %v2393_v49 }
 0x399   :  { %3498 = vmatmul.msk.f32.vlgmr.msra.gmra.mxu0 %vm2335_vm9, %v2394_v50 }
 0x416   :  { %v2420_v9 = vpop.f32.mrf.mxu0 }
 0x417   :  { %v2421_v47 = vadd.f32 %v2420_v9, %v2399_v51 }
 0x419   :  { %v2423_v23 = vsub.f32 0.0, %v2421_v47 }
 0x41b   :  { %v2424_v52 = vmul.f32 1.442695, %v2423_v23 }
 0x41d   :  { %3768 = vpow2.f32 %v2424_v52 }
 0x423   :  { %v3769_v53 = vpop.eup %3768 }
 0x424   :  { %v2426_v41 = vadd.f32 1.0, %v3769_v53 }
 0x426   :  { %3770 = vrcp.f32 %v2426_v41  ;;  %v2438_v57 = vand.u32 2147483648, %v2426_v41  ;;  %v2436_v59 = vand.u32 2147483647, %v2426_v41  ;;  %vm2432_vm11 = vweird.f32 %v2426_v41 }
 0x428   :  { %v2439_v62 = vor.u32 1.1754944e-38, %v2438_v57  ;;  %vm2437_vm14 = vcmp.eq.f32.partialorder %v2436_v59, 8.507059e+37 }
 0x42c   :  { %v3771_v55 = vpop.eup %3770 }
 0x42d   :  { %v2428_v43 = vmul.f32 %v3771_v55, %v2426_v41  ;;  %vm2433_vm10 = vweird.f32 %v3771_v55 }
 0x42e   :  { %vm2434_vm12 = vmor %vm2432_vm11, %vm2433_vm10 }
 0x42f   :  { %v2429_v54 = vsub.f32 1.0, %v2428_v43 }
 0x431   :  { %v2430_v58 = vmul.f32 %v3771_v55, %v2429_v54 }
 0x433   :  { %v2431_v60 = vadd.f32 %v3771_v55, %v2430_v58 }
 0x435   :  { %v2435_v63 = vsel %vm2434_vm12, %v3771_v55, %v2431_v60 }
 0x436   :  { %v2440_v0 = vsel %vm2437_vm14, %v2439_v62, %v2435_v63 }
 0x437   :  { %2443 = vst.msk [vmem:[#allocation9] sm:$0x1] %vm2442_vm13, %v2440_v0 }
 0x438   :  { %2454 = dma.vmem_to_hbm [thread:$0]  %s2450_s18, 16, %s2452_s2, [#allocation6]  }
 0x439   :  { %3848 = dma.done.wait [#allocation6], 16  }
 0x43a   :  { %3849 = vsyncadd [#allocation6], 4294967280 }
 0x43b   :  { %2459 = vsyncpa [#allocation5], 1 }
 0x43c   :  { %2460 = vsyncpa [#allocation8], 1 }
 0x43d   :  { %2461 = vsyncpa [#allocation6], 1 }

</bundles_post_ra>
